<compile_context>
chip_gen: v5e
topology: v5e:2x2
jax: 0.10.0
libtpu: 0.0.40
codegen_flags: <defaults>
</compile_context>

<pallas_src>
import functools

import jax
import jax.numpy as jnp
from jax.experimental import pallas as pl
from jax.experimental.pallas import tpu as pltpu


# ------------------------------ Pass A kernel --------------------------------
def _branches_kernel(x_ref,                       # (1, Cin, H*W)   NCHW block
                     wA_ref, bA_ref,              # (4*Cout, 2*Cin), (4*Cout, 1)
                     w35_ref, b35_ref,            # (2*Cout, 272),   (2*Cout, 1)
                     wf_ref, bf_ref,              # (Cout, 288),     (Cout, 1)
                     y_ref,                       # (1, Cout, H*W)   pre-BN
                     stat_ref,                    # (1, 2*Cout, 1)   [mean ; M2]
                     *, H, W, Cin, Cout):
    f32 = jnp.float32
    HW = H * W
    relu = lambda v: jnp.maximum(v, 0.0)

    xc = x_ref[...].reshape(Cin, HW)              # channel-major, lane q = h*W+w

    # ---- static per-lane indices (no vector integer division / remainder) ----
    q_idx = jax.lax.broadcasted_iota(jnp.int32, (1, HW), 1)
    if W & (W - 1) == 0:
        w_idx = q_idx & (W - 1)
    else:
        w_idx = jax.lax.broadcasted_iota(jnp.int32, (H, W), 1).reshape(1, HW)

    mask_cache = {}

    def col_mask(dxo):                            # True where 0 <= w + dxo < W
        if dxo not in mask_cache:
            mask_cache[dxo] = (w_idx >= -dxo) & (w_idx < W - dxo)
        return mask_cache[dxo]

    def shifted(src, delta):
        """src[:, q] -> src[:, q + delta], zero filled past the flat boundary."""
        if delta == 0:
            return src
        C = src.shape[0]
        if delta > 0:
            return jnp.concatenate([src[:, delta:], jnp.zeros((C, delta), f32)], 1)
        return jnp.concatenate([jnp.zeros((C, -delta), f32), src[:, :HW + delta]], 1)

    # ---- branch 2 front: 3x3 / s1 / p1 max-pool (separable, edge-safe) -------
    # Out-of-range window taps are -inf in the reference; reusing the centre
    # value at the edges gives the same max, so no -inf border is needed.
    xl = jnp.where(col_mask(1), shifted(xc, 1), xc)        # x[h, w+1] (clamped)
    xr = jnp.where(col_mask(-1), shifted(xc, -1), xc)      # x[h, w-1] (clamped)
    rmax = jnp.maximum(jnp.maximum(xc, xl), xr)
    ru = jnp.where(q_idx < HW - W, shifted(rmax, W), rmax)  # row h+1 (clamped)
    rd = jnp.where(q_idx >= W, shifted(rmax, -W), rmax)     # row h-1 (clamped)
    pool = jnp.maximum(jnp.maximum(rmax, ru), rd)           # (Cin, HW)

    # ---- fused 1x1 convs: conv1 | conv2(pool) | conv31 | conv41, one matmul --
    xin = jnp.concatenate([xc, pool], axis=0)               # (2*Cin, HW)
    t = relu(jnp.dot(wA_ref[...], xin, preferred_element_type=f32) + bA_ref[...])
    br1 = t[0 * Cout:1 * Cout]
    br2 = t[1 * Cout:2 * Cout]
    t31 = t[2 * Cout:3 * Cout]
    t41 = t[3 * Cout:4 * Cout]

    # ---- channel-major im2col: tap (dy, dx) = flat lane shift + column mask --
    # slab row order is (dy, dx, c), matching the flattened weights below.
    def im2col(src, K, p):
        wins = []
        for dy in range(K):
            for dx in range(K):
                v = shifted(src, (dy - p) * W + (dx - p))
                if dx != p:
                    v = jnp.where(col_mask(dx - p), v, 0.0)
                wins.append(v)
        return jnp.concatenate(wins, axis=0)                # (K*K*C, HW)

    # ---- fused conv32 (3x3) + conv42 (5x5): one block-diagonal matmul --------
    slab35 = jnp.concatenate([im2col(t31, 3, 1), im2col(t41, 5, 2)], axis=0)
    t35 = relu(jnp.dot(w35_ref[...], slab35, preferred_element_type=f32)
               + b35_ref[...])
    br3 = t35[:Cout]
    br4 = t35[Cout:]

    # ---- concat [conv1 | pool | 3x3 | 5x5] then fuse conv (3x3 over 4*Cout) --
    cat = jnp.concatenate([br1, br2, br3, br4], axis=0)     # (4*Cout, HW)
    yf = jnp.dot(wf_ref[...], im2col(cat, 3, 1),
                 preferred_element_type=f32) + bf_ref[...]  # (Cout, HW), pre-BN

    # ---- per-image BN partials (mean + M2), single small store ---------------
    tmean = jnp.mean(yf, axis=1, keepdims=True)             # (Cout, 1)
    d = yf - tmean
    m2 = jnp.sum(d * d, axis=1, keepdims=True)              # (Cout, 1)
    stat_ref[...] = jnp.concatenate([tmean, m2], axis=0).reshape(1, 2 * Cout, 1)

    # ---- lane-dense (H*W wide) NCHW output block -----------------------------
    y_ref[...] = yf.reshape(1, Cout, HW)


# ------------------------------ Pass B kernel --------------------------------
def _bn_relu_kernel(y_ref, scale_ref, shift_ref, out_ref):
    # (1, Cout, H*W) blocks: 256-lane loads/stores; per-channel affine + ReLU.
    out_ref[...] = jnp.maximum(y_ref[...] * scale_ref[...] + shift_ref[...], 0.0)


# --------------------------------- wrapper -----------------------------------
@jax.jit
def transition_block_pallas(x_nchw, params):
    """x_nchw: (N, Cin, H, W) float32; params: dict of PyTorch-layout weights."""
    N, Cin, H, W = x_nchw.shape
    Cout = params["conv1_w"].shape[0]
    HW = H * W
    f32 = jnp.float32

    # -------- weight prep (tiny, runs as part of the surrounding XLA program) -
    def w1x1_T(w):               # (O, C, 1, 1) -> (O, C)
        return w[:, :, 0, 0]

    def wkxk_T(w):               # (O, C, K, K) -> (O, K*K*C), cols in (dy, dx, c)
        O, C, K, _ = w.shape
        return jnp.transpose(w, (0, 2, 3, 1)).reshape(O, K * K * C)

    zc = jnp.zeros((Cout, Cin), f32)
    # rows = [conv1 | conv2 | conv31 | conv41]; cols = [x (Cin) | pooled x (Cin)]
    wA = jnp.concatenate([
        jnp.concatenate([w1x1_T(params["conv1_w"]), zc], axis=1),
        jnp.concatenate([zc, w1x1_T(params["conv2_w"])], axis=1),
        jnp.concatenate([w1x1_T(params["conv31_w"]), zc], axis=1),
        jnp.concatenate([w1x1_T(params["conv41_w"]), zc], axis=1)], axis=0)
    bA = jnp.concatenate([params["conv1_b"], params["conv2_b"],
                          params["conv31_b"], params["conv41_b"]]).reshape(4 * Cout, 1)

    w32T = wkxk_T(params["conv32_w"])            # (Cout, 9*Cout)
    w42T = wkxk_T(params["conv42_w"])            # (Cout, 25*Cout)
    w35 = jnp.concatenate([
        jnp.concatenate([w32T, jnp.zeros((Cout, 25 * Cout), f32)], axis=1),
        jnp.concatenate([jnp.zeros((Cout, 9 * Cout), f32), w42T], axis=1)], axis=0)
    b35 = jnp.concatenate([params["conv32_b"], params["conv42_b"]]).reshape(2 * Cout, 1)

    wf = wkxk_T(params["convf_w"])               # (Cout, 9*4*Cout)
    bf = params["convf_b"].reshape(Cout, 1)

    weight_args = (wA, bA, w35, b35, wf, bf)

    cparams = pltpu.CompilerParams(
        dimension_semantics=("parallel",),        # batch axis -> both v7x cores
        vmem_limit_bytes=32 * 1024 * 1024,        # fits v5e/v6e/v7x scoped VMEM
    )

    # -------- Pass A: all branches + convf, one image per grid step ----------
    # TODO(synk): for large H*W add an H-tile grid axis (halo via index_map) and
    # re-derive tile sizes against the v7x 64 MiB VMEM budget (2x double-buffer).
    x_r = x_nchw.reshape(N, Cin, HW)             # pure view, stays NCHW
    in_specs = ([pl.BlockSpec((1, Cin, HW), lambda n: (n, 0, 0))] +
                [pl.BlockSpec(a.shape, lambda n: (0, 0)) for a in weight_args])
    kern = functools.partial(_branches_kernel, H=H, W=W, Cin=Cin, Cout=Cout)
    y, stats = pl.pallas_call(
        kern,
        out_shape=(jax.ShapeDtypeStruct((N, Cout, HW), f32),
                   jax.ShapeDtypeStruct((N, 2 * Cout, 1), f32)),
        grid=(N,),
        in_specs=in_specs,
        out_specs=(pl.BlockSpec((1, Cout, HW), lambda n: (n, 0, 0)),
                   pl.BlockSpec((1, 2 * Cout, 1), lambda n: (n, 0, 0))),
        compiler_params=cparams,
    )(x_r, *weight_args)

    # -------- exact combine of per-image stats (Chan) -> BN scale / shift ----
    # TODO(synk): BatchNorm2d running_mean/running_var buffer updates (module
    # side effect, not part of the returned forward value) are not produced.
    tile_mean = stats[:, :Cout, 0]               # (N, Cout)
    tile_m2 = stats[:, Cout:, 0]                 # (N, Cout)
    mean = jnp.mean(tile_mean, axis=0)           # equal-count tiles
    m2_tot = jnp.sum(tile_m2 + HW * (tile_mean - mean[None, :]) ** 2, axis=0)
    var = m2_tot / (N * HW)                      # biased (BN training mode)
    inv = jax.lax.rsqrt(var + 1e-5)
    scale = (params["bn_gamma"] * inv).reshape(1, Cout, 1)
    shift = (params["bn_beta"] - mean * params["bn_gamma"] * inv).reshape(1, Cout, 1)

    # -------- Pass B: BN affine + ReLU, NCHW blocks straight out -------------
    out = pl.pallas_call(
        _bn_relu_kernel,
        out_shape=jax.ShapeDtypeStruct((N, Cout, HW), f32),
        grid=(N,),
        in_specs=[pl.BlockSpec((1, Cout, HW), lambda n: (n, 0, 0)),
                  pl.BlockSpec((1, Cout, 1), lambda n: (0, 0, 0)),
                  pl.BlockSpec((1, Cout, 1), lambda n: (0, 0, 0))],
        out_specs=pl.BlockSpec((1, Cout, HW), lambda n: (n, 0, 0)),
        compiler_params=cparams,
    )(y, scale, shift)

    return out.reshape(N, Cout, H, W)            # already NCHW, pure view


# ---------------------------- pure-JAX reference -----------------------------
def _conv(x, w, b, pad):
    y = jax.lax.conv_general_dilated(
        x, w, window_strides=(1, 1),
        padding=[(pad, pad), (pad, pad)],
        dimension_numbers=("NCHW", "OIHW", "NCHW"),
        precision=jax.lax.Precision.HIGHEST)
    return y + b[None, :, None, None]


def transition_block_ref(x, p):
    relu = lambda v: jnp.maximum(v, 0.0)
    b1 = relu(_conv(x, p["conv1_w"], p["conv1_b"], 0))
    pooled = jax.lax.reduce_window(
        x, -jnp.inf, jax.lax.max, (1, 1, 3, 3), (1, 1, 1, 1),
        [(0, 0), (0, 0), (1, 1), (1, 1)])
    b2 = relu(_conv(pooled, p["conv2_w"], p["conv2_b"], 0))
    b3 = relu(_conv(relu(_conv(x, p["conv31_w"], p["conv31_b"], 0)),
                    p["conv32_w"], p["conv32_b"], 1))
    b4 = relu(_conv(relu(_conv(x, p["conv41_w"], p["conv41_b"], 0)),
                    p["conv42_w"], p["conv42_b"], 2))
    cat = jnp.concatenate([b1, b2, b3, b4], axis=1)
    y = _conv(cat, p["convf_w"], p["convf_b"], 1)
    mean = jnp.mean(y, axis=(0, 2, 3), keepdims=True)
    var = jnp.mean((y - mean) ** 2, axis=(0, 2, 3), keepdims=True)
    yn = (y - mean) * jax.lax.rsqrt(var + 1e-5)
    yn = yn * p["bn_gamma"][None, :, None, None] + p["bn_beta"][None, :, None, None]
    return relu(yn)


# ----------------------------------- main -------------------------------------
if __name__ == "__main__":
    N, Cin, Cout, H, W = 2, 4, 8, 16, 16

    key = jax.random.PRNGKey(0)
    keys = jax.random.split(key, 20)
    r = lambda k, shape: (0.1 * jax.random.normal(k, shape)).astype(jnp.float32)

    params = {
        "conv1_w": r(keys[0], (Cout, Cin, 1, 1)),  "conv1_b": r(keys[1], (Cout,)),
        "conv2_w": r(keys[2], (Cout, Cin, 1, 1)),  "conv2_b": r(keys[3], (Cout,)),
        "conv31_w": r(keys[4], (Cout, Cin, 1, 1)), "conv31_b": r(keys[5], (Cout,)),
        "conv32_w": r(keys[6], (Cout, Cout, 3, 3)), "conv32_b": r(keys[7], (Cout,)),
        "conv41_w": r(keys[8], (Cout, Cin, 1, 1)), "conv41_b": r(keys[9], (Cout,)),
        "conv42_w": r(keys[10], (Cout, Cout, 5, 5)), "conv42_b": r(keys[11], (Cout,)),
        "convf_w": r(keys[12], (Cout, 4 * Cout, 3, 3)), "convf_b": r(keys[13], (Cout,)),
        "bn_gamma": (1.0 + 0.1 * jax.random.normal(keys[14], (Cout,))).astype(jnp.float32),
        "bn_beta": r(keys[15], (Cout,)),
    }
    x = jax.random.normal(keys[16], (N, Cin, H, W), dtype=jnp.float32)

    out = jax.block_until_ready(transition_block_pallas(x, params))
    ref = jax.block_until_ready(transition_block_ref(x, params))

    assert out.shape == (N, Cout, H, W)
    assert jnp.allclose(out, ref, atol=2e-2, rtol=2e-2), (
        f"max abs err {jnp.max(jnp.abs(out - ref))}")
    print("KERNEL_OK")
</pallas_src>

<mosaic_0001>
module attributes {stable_mosaic.version = 11 : i64} {
  func.func @_bn_relu_kernel(%arg0: i32, %arg1: memref<1x8x256xf32, #tpu.memory_space<vmem>>, %arg2: memref<1x8x1xf32, #tpu.memory_space<vmem>>, %arg3: memref<1x8x1xf32, #tpu.memory_space<vmem>>, %arg4: memref<1x8x256xf32, #tpu.memory_space<vmem>>) attributes {dimension_semantics = [#tpu.dimension_semantics<parallel>], iteration_bounds = array<i64: 2>, scalar_prefetch = 0 : i64, scratch_operands = 0 : i64, tpu.core_type = #tpu.core_type<tc>, window_params = [{transform_indices = @transform_0, window_bounds = array<i64: 1, 8, 256>}, {pipeline_mode = #tpu.pipeline_mode<synchronous>, transform_indices = @transform_1, window_bounds = array<i64: 1, 8, 1>}, {pipeline_mode = #tpu.pipeline_mode<synchronous>, transform_indices = @transform_2, window_bounds = array<i64: 1, 8, 1>}, {transform_indices = @transform_3, window_bounds = array<i64: 1, 8, 256>}]} {
    %c0 = arith.constant 0 : index
    %c0_0 = arith.constant 0 : index
    %c0_1 = arith.constant 0 : index
    %0 = vector.load %arg1[%c0, %c0_0, %c0_1] : memref<1x8x256xf32, #tpu.memory_space<vmem>>, vector<1x8x256xf32>
    %c0_2 = arith.constant 0 : index
    %c0_3 = arith.constant 0 : index
    %c0_4 = arith.constant 0 : index
    %1 = vector.load %arg2[%c0_2, %c0_3, %c0_4] : memref<1x8x1xf32, #tpu.memory_space<vmem>>, vector<1x8x1xf32>
    %2 = vector.broadcast %1 : vector<1x8x1xf32> to vector<1x8x256xf32>
    %3 = arith.mulf %0, %2 : vector<1x8x256xf32>
    %c0_5 = arith.constant 0 : index
    %c0_6 = arith.constant 0 : index
    %c0_7 = arith.constant 0 : index
    %4 = vector.load %arg3[%c0_5, %c0_6, %c0_7] : memref<1x8x1xf32, #tpu.memory_space<vmem>>, vector<1x8x1xf32>
    %5 = vector.broadcast %4 : vector<1x8x1xf32> to vector<1x8x256xf32>
    %6 = arith.addf %3, %5 : vector<1x8x256xf32>
    %cst = arith.constant 0.000000e+00 : f32
    %7 = vector.broadcast %cst : f32 to vector<1x8x256xf32>
    %8 = arith.maximumf %6, %7 : vector<1x8x256xf32>
    %c0_8 = arith.constant 0 : index
    %c0_9 = arith.constant 0 : index
    %c0_10 = arith.constant 0 : index
    %9 = vector.load %arg4[%c0_8, %c0_9, %c0_10] : memref<1x8x256xf32, #tpu.memory_space<vmem>>, vector<1x8x256xf32>
    tpu.vector_store %arg4[%c0_8, %c0_9, %c0_10], %8 {strides = array<i32>} : memref<1x8x256xf32, #tpu.memory_space<vmem>>, vector<1x8x256xf32>,
    return
  }
  func.func @transform_0(%arg0: i32) -> (i32, i32, i32) {
    %c0_i32 = arith.constant 0 : i32
    %c0_i32_0 = arith.constant 0 : i32
    %c0_i32_1 = arith.constant 0 : i32
    return %arg0, %c0_i32, %c0_i32_0 : i32, i32, i32
  }
  func.func @transform_1(%arg0: i32) -> (i32, i32, i32) {
    %c0_i32 = arith.constant 0 : i32
    %c0_i32_0 = arith.constant 0 : i32
    %c0_i32_1 = arith.constant 0 : i32
    %c0_i32_2 = arith.constant 0 : i32
    return %c0_i32, %c0_i32_0, %c0_i32_1 : i32, i32, i32
  }
  func.func @transform_2(%arg0: i32) -> (i32, i32, i32) {
    %c0_i32 = arith.constant 0 : i32
    %c0_i32_0 = arith.constant 0 : i32
    %c0_i32_1 = arith.constant 0 : i32
    %c0_i32_2 = arith.constant 0 : i32
    return %c0_i32, %c0_i32_0, %c0_i32_1 : i32, i32, i32
  }
  func.func @transform_3(%arg0: i32) -> (i32, i32, i32) {
    %c0_i32 = arith.constant 0 : i32
    %c0_i32_0 = arith.constant 0 : i32
    %c0_i32_1 = arith.constant 0 : i32
    return %arg0, %c0_i32, %c0_i32_0 : i32, i32, i32
  }
}

module attributes {stable_mosaic.version = 11 : i64} {
  func.func @_branches_kernel(%arg0: i32, %arg1: memref<1x4x256xf32, #tpu.memory_space<vmem>>, %arg2: memref<32x8xf32, #tpu.memory_space<vmem>>, %arg3: memref<32x1xf32, #tpu.memory_space<vmem>>, %arg4: memref<16x272xf32, #tpu.memory_space<vmem>>, %arg5: memref<16x1xf32, #tpu.memory_space<vmem>>, %arg6: memref<8x288xf32, #tpu.memory_space<vmem>>, %arg7: memref<8x1xf32, #tpu.memory_space<vmem>>, %arg8: memref<1x8x256xf32, #tpu.memory_space<vmem>>, %arg9: memref<1x16x1xf32, #tpu.memory_space<vmem>>) attributes {dimension_semantics = [#tpu.dimension_semantics<parallel>], iteration_bounds = array<i64: 2>, scalar_prefetch = 0 : i64, scratch_operands = 0 : i64, tpu.core_type = #tpu.core_type<tc>, window_params = [{transform_indices = @transform_0, window_bounds = array<i64: 1, 4, 256>}, {pipeline_mode = #tpu.pipeline_mode<synchronous>, transform_indices = @transform_1, window_bounds = array<i64: 32, 8>}, {pipeline_mode = #tpu.pipeline_mode<synchronous>, transform_indices = @transform_2, window_bounds = array<i64: 32, 1>}, {pipeline_mode = #tpu.pipeline_mode<synchronous>, transform_indices = @transform_3, window_bounds = array<i64: 16, 272>}, {pipeline_mode = #tpu.pipeline_mode<synchronous>, transform_indices = @transform_4, window_bounds = array<i64: 16, 1>}, {pipeline_mode = #tpu.pipeline_mode<synchronous>, transform_indices = @transform_5, window_bounds = array<i64: 8, 288>}, {pipeline_mode = #tpu.pipeline_mode<synchronous>, transform_indices = @transform_6, window_bounds = array<i64: 8, 1>}, {transform_indices = @transform_7, window_bounds = array<i64: 1, 8, 256>}, {transform_indices = @transform_8, window_bounds = array<i64: 1, 16, 1>}]} {
    %c0 = arith.constant 0 : index
    %c0_0 = arith.constant 0 : index
    %c0_1 = arith.constant 0 : index
    %0 = vector.load %arg1[%c0, %c0_0, %c0_1] : memref<1x4x256xf32, #tpu.memory_space<vmem>>, vector<1x4x256xf32>
    %1 = vector.shape_cast %0 : vector<1x4x256xf32> to vector<4x256xf32>
    %2 = tpu.iota {dimensions = array<i32: 1>} : vector<1x256xi32>
    %c15_i32 = arith.constant 15 : i32
    %3 = vector.broadcast %c15_i32 : i32 to vector<1x256xi32>
    %4 = arith.andi %2, %3 : vector<1x256xi32>
    %c-1_i32 = arith.constant -1 : i32
    %5 = vector.broadcast %c-1_i32 : i32 to vector<1x256xi32>
    %6 = arith.cmpi sge, %4, %5 : vector<1x256xi32>
    %c15_i32_2 = arith.constant 15 : i32
    %7 = vector.broadcast %c15_i32_2 : i32 to vector<1x256xi32>
    %8 = arith.cmpi slt, %4, %7 : vector<1x256xi32>
    %9 = arith.andi %6, %8 : vector<1x256xi1>
    %10 = vector.extract_strided_slice %1 {offsets = [0, 1], sizes = [4, 255], strides = [1, 1]} : vector<4x256xf32> to vector<4x255xf32>
    %cst = arith.constant 0.000000e+00 : f32
    %11 = vector.broadcast %cst : f32 to vector<4x1xf32>
    %12 = tpu.concatenate %10, %11 in 1 : vector<4x255xf32>, vector<4x1xf32> -> vector<4x256xf32>
    %13 = vector.shape_cast %9 : vector<1x256xi1> to vector<1x256xi1>
    %14 = vector.broadcast %13 : vector<1x256xi1> to vector<4x256xi1>
    %15 = arith.select %14, %12, %1 : vector<4x256xi1>, vector<4x256xf32>
    %c1_i32 = arith.constant 1 : i32
    %16 = vector.broadcast %c1_i32 : i32 to vector<1x256xi32>
    %17 = arith.cmpi sge, %4, %16 : vector<1x256xi32>
    %c17_i32 = arith.constant 17 : i32
    %18 = vector.broadcast %c17_i32 : i32 to vector<1x256xi32>
    %19 = arith.cmpi slt, %4, %18 : vector<1x256xi32>
    %20 = arith.andi %17, %19 : vector<1x256xi1>
    %cst_3 = arith.constant 0.000000e+00 : f32
    %21 = vector.broadcast %cst_3 : f32 to vector<4x1xf32>
    %22 = vector.extract_strided_slice %1 {offsets = [0, 0], sizes = [4, 255], strides = [1, 1]} : vector<4x256xf32> to vector<4x255xf32>
    %23 = tpu.concatenate %21, %22 in 1 : vector<4x1xf32>, vector<4x255xf32> -> vector<4x256xf32>
    %24 = vector.shape_cast %20 : vector<1x256xi1> to vector<1x256xi1>
    %25 = vector.broadcast %24 : vector<1x256xi1> to vector<4x256xi1>
    %26 = arith.select %25, %23, %1 : vector<4x256xi1>, vector<4x256xf32>
    %27 = arith.maximumf %1, %15 : vector<4x256xf32>
    %28 = arith.maximumf %27, %26 : vector<4x256xf32>
    %c240_i32 = arith.constant 240 : i32
    %29 = vector.broadcast %c240_i32 : i32 to vector<1x256xi32>
    %30 = arith.cmpi slt, %2, %29 : vector<1x256xi32>
    %31 = vector.extract_strided_slice %28 {offsets = [0, 16], sizes = [4, 240], strides = [1, 1]} : vector<4x256xf32> to vector<4x240xf32>
    %cst_4 = arith.constant 0.000000e+00 : f32
    %32 = vector.broadcast %cst_4 : f32 to vector<4x16xf32>
    %33 = tpu.concatenate %31, %32 in 1 : vector<4x240xf32>, vector<4x16xf32> -> vector<4x256xf32>
    %34 = vector.shape_cast %30 : vector<1x256xi1> to vector<1x256xi1>
    %35 = vector.broadcast %34 : vector<1x256xi1> to vector<4x256xi1>
    %36 = arith.select %35, %33, %28 : vector<4x256xi1>, vector<4x256xf32>
    %c16_i32 = arith.constant 16 : i32
    %37 = vector.broadcast %c16_i32 : i32 to vector<1x256xi32>
    %38 = arith.cmpi sge, %2, %37 : vector<1x256xi32>
    %cst_5 = arith.constant 0.000000e+00 : f32
    %39 = vector.broadcast %cst_5 : f32 to vector<4x16xf32>
    %40 = vector.extract_strided_slice %28 {offsets = [0, 0], sizes = [4, 240], strides = [1, 1]} : vector<4x256xf32> to vector<4x240xf32>
    %41 = tpu.concatenate %39, %40 in 1 : vector<4x16xf32>, vector<4x240xf32> -> vector<4x256xf32>
    %42 = vector.shape_cast %38 : vector<1x256xi1> to vector<1x256xi1>
    %43 = vector.broadcast %42 : vector<1x256xi1> to vector<4x256xi1>
    %44 = arith.select %43, %41, %28 : vector<4x256xi1>, vector<4x256xf32>
    %45 = arith.maximumf %28, %36 : vector<4x256xf32>
    %46 = arith.maximumf %45, %44 : vector<4x256xf32>
    %47 = tpu.concatenate %1, %46 in 0 : vector<4x256xf32>, vector<4x256xf32> -> vector<8x256xf32>
    %c0_6 = arith.constant 0 : index
    %c0_7 = arith.constant 0 : index
    %48 = vector.load %arg2[%c0_6, %c0_7] : memref<32x8xf32, #tpu.memory_space<vmem>>, vector<32x8xf32>
    %cst_8 = arith.constant dense<0.000000e+00> : vector<32x256xf32>
    %49 = tpu.matmul %48, %47, %cst_8 {dimension_numbers = #tpu.dot_dimension_numbers<[1], [0], [0], [1], [0, 0, 1, 1], [], []>} : vector<32x8xf32>, vector<8x256xf32>, vector<32x256xf32> -> vector<32x256xf32>
    %c0_9 = arith.constant 0 : index
    %c0_10 = arith.constant 0 : index
    %50 = vector.load %arg3[%c0_9, %c0_10] : memref<32x1xf32, #tpu.memory_space<vmem>>, vector<32x1xf32>
    %51 = vector.broadcast %50 : vector<32x1xf32> to vector<32x256xf32>
    %52 = arith.addf %49, %51 : vector<32x256xf32>
    %cst_11 = arith.constant 0.000000e+00 : f32
    %53 = vector.broadcast %cst_11 : f32 to vector<32x256xf32>
    %54 = arith.maximumf %52, %53 : vector<32x256xf32>
    %55 = vector.extract_strided_slice %54 {offsets = [0, 0], sizes = [8, 256], strides = [1, 1]} : vector<32x256xf32> to vector<8x256xf32>
    %56 = vector.extract_strided_slice %54 {offsets = [8, 0], sizes = [8, 256], strides = [1, 1]} : vector<32x256xf32> to vector<8x256xf32>
    %57 = vector.extract_strided_slice %54 {offsets = [16, 0], sizes = [8, 256], strides = [1, 1]} : vector<32x256xf32> to vector<8x256xf32>
    %58 = vector.extract_strided_slice %54 {offsets = [24, 0], sizes = [8, 256], strides = [1, 1]} : vector<32x256xf32> to vector<8x256xf32>
    %cst_12 = arith.constant 0.000000e+00 : f32
    %59 = vector.broadcast %cst_12 : f32 to vector<8x17xf32>
    %60 = vector.extract_strided_slice %57 {offsets = [0, 0], sizes = [8, 239], strides = [1, 1]} : vector<8x256xf32> to vector<8x239xf32>
    %61 = tpu.concatenate %59, %60 in 1 : vector<8x17xf32>, vector<8x239xf32> -> vector<8x256xf32>
    %cst_13 = arith.constant 0.000000e+00 : f32
    %62 = vector.shape_cast %20 : vector<1x256xi1> to vector<1x256xi1>
    %63 = vector.broadcast %62 : vector<1x256xi1> to vector<8x256xi1>
    %64 = vector.broadcast %cst_13 : f32 to vector<8x256xf32>
    %65 = arith.select %63, %61, %64 : vector<8x256xi1>, vector<8x256xf32>
    %cst_14 = arith.constant 0.000000e+00 : f32
    %66 = vector.broadcast %cst_14 : f32 to vector<8x16xf32>
    %67 = vector.extract_strided_slice %57 {offsets = [0, 0], sizes = [8, 240], strides = [1, 1]} : vector<8x256xf32> to vector<8x240xf32>
    %68 = tpu.concatenate %66, %67 in 1 : vector<8x16xf32>, vector<8x240xf32> -> vector<8x256xf32>
    %cst_15 = arith.constant 0.000000e+00 : f32
    %69 = vector.broadcast %cst_15 : f32 to vector<8x15xf32>
    %70 = vector.extract_strided_slice %57 {offsets = [0, 0], sizes = [8, 241], strides = [1, 1]} : vector<8x256xf32> to vector<8x241xf32>
    %71 = tpu.concatenate %69, %70 in 1 : vector<8x15xf32>, vector<8x241xf32> -> vector<8x256xf32>
    %cst_16 = arith.constant 0.000000e+00 : f32
    %72 = vector.shape_cast %9 : vector<1x256xi1> to vector<1x256xi1>
    %73 = vector.broadcast %72 : vector<1x256xi1> to vector<8x256xi1>
    %74 = vector.broadcast %cst_16 : f32 to vector<8x256xf32>
    %75 = arith.select %73, %71, %74 : vector<8x256xi1>, vector<8x256xf32>
    %cst_17 = arith.constant 0.000000e+00 : f32
    %76 = vector.broadcast %cst_17 : f32 to vector<8x1xf32>
    %77 = vector.extract_strided_slice %57 {offsets = [0, 0], sizes = [8, 255], strides = [1, 1]} : vector<8x256xf32> to vector<8x255xf32>
    %78 = tpu.concatenate %76, %77 in 1 : vector<8x1xf32>, vector<8x255xf32> -> vector<8x256xf32>
    %cst_18 = arith.constant 0.000000e+00 : f32
    %79 = vector.shape_cast %20 : vector<1x256xi1> to vector<1x256xi1>
    %80 = vector.broadcast %79 : vector<1x256xi1> to vector<8x256xi1>
    %81 = vector.broadcast %cst_18 : f32 to vector<8x256xf32>
    %82 = arith.select %80, %78, %81 : vector<8x256xi1>, vector<8x256xf32>
    %83 = vector.extract_strided_slice %57 {offsets = [0, 1], sizes = [8, 255], strides = [1, 1]} : vector<8x256xf32> to vector<8x255xf32>
    %cst_19 = arith.constant 0.000000e+00 : f32
    %84 = vector.broadcast %cst_19 : f32 to vector<8x1xf32>
    %85 = tpu.concatenate %83, %84 in 1 : vector<8x255xf32>, vector<8x1xf32> -> vector<8x256xf32>
    %cst_20 = arith.constant 0.000000e+00 : f32
    %86 = vector.shape_cast %9 : vector<1x256xi1> to vector<1x256xi1>
    %87 = vector.broadcast %86 : vector<1x256xi1> to vector<8x256xi1>
    %88 = vector.broadcast %cst_20 : f32 to vector<8x256xf32>
    %89 = arith.select %87, %85, %88 : vector<8x256xi1>, vector<8x256xf32>
    %90 = vector.extract_strided_slice %57 {offsets = [0, 15], sizes = [8, 241], strides = [1, 1]} : vector<8x256xf32> to vector<8x241xf32>
    %cst_21 = arith.constant 0.000000e+00 : f32
    %91 = vector.broadcast %cst_21 : f32 to vector<8x15xf32>
    %92 = tpu.concatenate %90, %91 in 1 : vector<8x241xf32>, vector<8x15xf32> -> vector<8x256xf32>
    %cst_22 = arith.constant 0.000000e+00 : f32
    %93 = vector.shape_cast %20 : vector<1x256xi1> to vector<1x256xi1>
    %94 = vector.broadcast %93 : vector<1x256xi1> to vector<8x256xi1>
    %95 = vector.broadcast %cst_22 : f32 to vector<8x256xf32>
    %96 = arith.select %94, %92, %95 : vector<8x256xi1>, vector<8x256xf32>
    %97 = vector.extract_strided_slice %57 {offsets = [0, 16], sizes = [8, 240], strides = [1, 1]} : vector<8x256xf32> to vector<8x240xf32>
    %cst_23 = arith.constant 0.000000e+00 : f32
    %98 = vector.broadcast %cst_23 : f32 to vector<8x16xf32>
    %99 = tpu.concatenate %97, %98 in 1 : vector<8x240xf32>, vector<8x16xf32> -> vector<8x256xf32>
    %100 = vector.extract_strided_slice %57 {offsets = [0, 17], sizes = [8, 239], strides = [1, 1]} : vector<8x256xf32> to vector<8x239xf32>
    %cst_24 = arith.constant 0.000000e+00 : f32
    %101 = vector.broadcast %cst_24 : f32 to vector<8x17xf32>
    %102 = tpu.concatenate %100, %101 in 1 : vector<8x239xf32>, vector<8x17xf32> -> vector<8x256xf32>
    %cst_25 = arith.constant 0.000000e+00 : f32
    %103 = vector.shape_cast %9 : vector<1x256xi1> to vector<1x256xi1>
    %104 = vector.broadcast %103 : vector<1x256xi1> to vector<8x256xi1>
    %105 = vector.broadcast %cst_25 : f32 to vector<8x256xf32>
    %106 = arith.select %104, %102, %105 : vector<8x256xi1>, vector<8x256xf32>
    %107 = tpu.concatenate %65, %68, %75, %82, %57, %89, %96, %99, %106 in 0 : vector<8x256xf32>, vector<8x256xf32>, vector<8x256xf32>, vector<8x256xf32>, vector<8x256xf32>, vector<8x256xf32>, vector<8x256xf32>, vector<8x256xf32>, vector<8x256xf32> -> vector<72x256xf32>
    %cst_26 = arith.constant 0.000000e+00 : f32
    %108 = vector.broadcast %cst_26 : f32 to vector<8x34xf32>
    %109 = vector.extract_strided_slice %58 {offsets = [0, 0], sizes = [8, 222], strides = [1, 1]} : vector<8x256xf32> to vector<8x222xf32>
    %110 = tpu.concatenate %108, %109 in 1 : vector<8x34xf32>, vector<8x222xf32> -> vector<8x256xf32>
    %c2_i32 = arith.constant 2 : i32
    %111 = vector.broadcast %c2_i32 : i32 to vector<1x256xi32>
    %112 = arith.cmpi sge, %4, %111 : vector<1x256xi32>
    %c18_i32 = arith.constant 18 : i32
    %113 = vector.broadcast %c18_i32 : i32 to vector<1x256xi32>
    %114 = arith.cmpi slt, %4, %113 : vector<1x256xi32>
    %115 = arith.andi %112, %114 : vector<1x256xi1>
    %cst_27 = arith.constant 0.000000e+00 : f32
    %116 = vector.shape_cast %115 : vector<1x256xi1> to vector<1x256xi1>
    %117 = vector.broadcast %116 : vector<1x256xi1> to vector<8x256xi1>
    %118 = vector.broadcast %cst_27 : f32 to vector<8x256xf32>
    %119 = arith.select %117, %110, %118 : vector<8x256xi1>, vector<8x256xf32>
    %cst_28 = arith.constant 0.000000e+00 : f32
    %120 = vector.broadcast %cst_28 : f32 to vector<8x33xf32>
    %121 = vector.extract_strided_slice %58 {offsets = [0, 0], sizes = [8, 223], strides = [1, 1]} : vector<8x256xf32> to vector<8x223xf32>
    %122 = tpu.concatenate %120, %121 in 1 : vector<8x33xf32>, vector<8x223xf32> -> vector<8x256xf32>
    %cst_29 = arith.constant 0.000000e+00 : f32
    %123 = vector.shape_cast %20 : vector<1x256xi1> to vector<1x256xi1>
    %124 = vector.broadcast %123 : vector<1x256xi1> to vector<8x256xi1>
    %125 = vector.broadcast %cst_29 : f32 to vector<8x256xf32>
    %126 = arith.select %124, %122, %125 : vector<8x256xi1>, vector<8x256xf32>
    %cst_30 = arith.constant 0.000000e+00 : f32
    %127 = vector.broadcast %cst_30 : f32 to vector<8x32xf32>
    %128 = vector.extract_strided_slice %58 {offsets = [0, 0], sizes = [8, 224], strides = [1, 1]} : vector<8x256xf32> to vector<8x224xf32>
    %129 = tpu.concatenate %127, %128 in 1 : vector<8x32xf32>, vector<8x224xf32> -> vector<8x256xf32>
    %cst_31 = arith.constant 0.000000e+00 : f32
    %130 = vector.broadcast %cst_31 : f32 to vector<8x31xf32>
    %131 = vector.extract_strided_slice %58 {offsets = [0, 0], sizes = [8, 225], strides = [1, 1]} : vector<8x256xf32> to vector<8x225xf32>
    %132 = tpu.concatenate %130, %131 in 1 : vector<8x31xf32>, vector<8x225xf32> -> vector<8x256xf32>
    %cst_32 = arith.constant 0.000000e+00 : f32
    %133 = vector.shape_cast %9 : vector<1x256xi1> to vector<1x256xi1>
    %134 = vector.broadcast %133 : vector<1x256xi1> to vector<8x256xi1>
    %135 = vector.broadcast %cst_32 : f32 to vector<8x256xf32>
    %136 = arith.select %134, %132, %135 : vector<8x256xi1>, vector<8x256xf32>
    %cst_33 = arith.constant 0.000000e+00 : f32
    %137 = vector.broadcast %cst_33 : f32 to vector<8x30xf32>
    %138 = vector.extract_strided_slice %58 {offsets = [0, 0], sizes = [8, 226], strides = [1, 1]} : vector<8x256xf32> to vector<8x226xf32>
    %139 = tpu.concatenate %137, %138 in 1 : vector<8x30xf32>, vector<8x226xf32> -> vector<8x256xf32>
    %c-2_i32 = arith.constant -2 : i32
    %140 = vector.broadcast %c-2_i32 : i32 to vector<1x256xi32>
    %141 = arith.cmpi sge, %4, %140 : vector<1x256xi32>
    %c14_i32 = arith.constant 14 : i32
    %142 = vector.broadcast %c14_i32 : i32 to vector<1x256xi32>
    %143 = arith.cmpi slt, %4, %142 : vector<1x256xi32>
    %144 = arith.andi %141, %143 : vector<1x256xi1>
    %cst_34 = arith.constant 0.000000e+00 : f32
    %145 = vector.shape_cast %144 : vector<1x256xi1> to vector<1x256xi1>
    %146 = vector.broadcast %145 : vector<1x256xi1> to vector<8x256xi1>
    %147 = vector.broadcast %cst_34 : f32 to vector<8x256xf32>
    %148 = arith.select %146, %139, %147 : vector<8x256xi1>, vector<8x256xf32>
    %cst_35 = arith.constant 0.000000e+00 : f32
    %149 = vector.broadcast %cst_35 : f32 to vector<8x18xf32>
    %150 = vector.extract_strided_slice %58 {offsets = [0, 0], sizes = [8, 238], strides = [1, 1]} : vector<8x256xf32> to vector<8x238xf32>
    %151 = tpu.concatenate %149, %150 in 1 : vector<8x18xf32>, vector<8x238xf32> -> vector<8x256xf32>
    %cst_36 = arith.constant 0.000000e+00 : f32
    %152 = vector.shape_cast %115 : vector<1x256xi1> to vector<1x256xi1>
    %153 = vector.broadcast %152 : vector<1x256xi1> to vector<8x256xi1>
    %154 = vector.broadcast %cst_36 : f32 to vector<8x256xf32>
    %155 = arith.select %153, %151, %154 : vector<8x256xi1>, vector<8x256xf32>
    %cst_37 = arith.constant 0.000000e+00 : f32
    %156 = vector.broadcast %cst_37 : f32 to vector<8x17xf32>
    %157 = vector.extract_strided_slice %58 {offsets = [0, 0], sizes = [8, 239], strides = [1, 1]} : vector<8x256xf32> to vector<8x239xf32>
    %158 = tpu.concatenate %156, %157 in 1 : vector<8x17xf32>, vector<8x239xf32> -> vector<8x256xf32>
    %cst_38 = arith.constant 0.000000e+00 : f32
    %159 = vector.shape_cast %20 : vector<1x256xi1> to vector<1x256xi1>
    %160 = vector.broadcast %159 : vector<1x256xi1> to vector<8x256xi1>
    %161 = vector.broadcast %cst_38 : f32 to vector<8x256xf32>
    %162 = arith.select %160, %158, %161 : vector<8x256xi1>, vector<8x256xf32>
    %cst_39 = arith.constant 0.000000e+00 : f32
    %163 = vector.broadcast %cst_39 : f32 to vector<8x16xf32>
    %164 = vector.extract_strided_slice %58 {offsets = [0, 0], sizes = [8, 240], strides = [1, 1]} : vector<8x256xf32> to vector<8x240xf32>
    %165 = tpu.concatenate %163, %164 in 1 : vector<8x16xf32>, vector<8x240xf32> -> vector<8x256xf32>
    %cst_40 = arith.constant 0.000000e+00 : f32
    %166 = vector.broadcast %cst_40 : f32 to vector<8x15xf32>
    %167 = vector.extract_strided_slice %58 {offsets = [0, 0], sizes = [8, 241], strides = [1, 1]} : vector<8x256xf32> to vector<8x241xf32>
    %168 = tpu.concatenate %166, %167 in 1 : vector<8x15xf32>, vector<8x241xf32> -> vector<8x256xf32>
    %cst_41 = arith.constant 0.000000e+00 : f32
    %169 = vector.shape_cast %9 : vector<1x256xi1> to vector<1x256xi1>
    %170 = vector.broadcast %169 : vector<1x256xi1> to vector<8x256xi1>
    %171 = vector.broadcast %cst_41 : f32 to vector<8x256xf32>
    %172 = arith.select %170, %168, %171 : vector<8x256xi1>, vector<8x256xf32>
    %cst_42 = arith.constant 0.000000e+00 : f32
    %173 = vector.broadcast %cst_42 : f32 to vector<8x14xf32>
    %174 = vector.extract_strided_slice %58 {offsets = [0, 0], sizes = [8, 242], strides = [1, 1]} : vector<8x256xf32> to vector<8x242xf32>
    %175 = tpu.concatenate %173, %174 in 1 : vector<8x14xf32>, vector<8x242xf32> -> vector<8x256xf32>
    %cst_43 = arith.constant 0.000000e+00 : f32
    %176 = vector.shape_cast %144 : vector<1x256xi1> to vector<1x256xi1>
    %177 = vector.broadcast %176 : vector<1x256xi1> to vector<8x256xi1>
    %178 = vector.broadcast %cst_43 : f32 to vector<8x256xf32>
    %179 = arith.select %177, %175, %178 : vector<8x256xi1>, vector<8x256xf32>
    %cst_44 = arith.constant 0.000000e+00 : f32
    %180 = vector.broadcast %cst_44 : f32 to vector<8x2xf32>
    %181 = vector.extract_strided_slice %58 {offsets = [0, 0], sizes = [8, 254], strides = [1, 1]} : vector<8x256xf32> to vector<8x254xf32>
    %182 = tpu.concatenate %180, %181 in 1 : vector<8x2xf32>, vector<8x254xf32> -> vector<8x256xf32>
    %cst_45 = arith.constant 0.000000e+00 : f32
    %183 = vector.shape_cast %115 : vector<1x256xi1> to vector<1x256xi1>
    %184 = vector.broadcast %183 : vector<1x256xi1> to vector<8x256xi1>
    %185 = vector.broadcast %cst_45 : f32 to vector<8x256xf32>
    %186 = arith.select %184, %182, %185 : vector<8x256xi1>, vector<8x256xf32>
    %cst_46 = arith.constant 0.000000e+00 : f32
    %187 = vector.broadcast %cst_46 : f32 to vector<8x1xf32>
    %188 = vector.extract_strided_slice %58 {offsets = [0, 0], sizes = [8, 255], strides = [1, 1]} : vector<8x256xf32> to vector<8x255xf32>
    %189 = tpu.concatenate %187, %188 in 1 : vector<8x1xf32>, vector<8x255xf32> -> vector<8x256xf32>
    %cst_47 = arith.constant 0.000000e+00 : f32
    %190 = vector.shape_cast %20 : vector<1x256xi1> to vector<1x256xi1>
    %191 = vector.broadcast %190 : vector<1x256xi1> to vector<8x256xi1>
    %192 = vector.broadcast %cst_47 : f32 to vector<8x256xf32>
    %193 = arith.select %191, %189, %192 : vector<8x256xi1>, vector<8x256xf32>
    %194 = vector.extract_strided_slice %58 {offsets = [0, 1], sizes = [8, 255], strides = [1, 1]} : vector<8x256xf32> to vector<8x255xf32>
    %cst_48 = arith.constant 0.000000e+00 : f32
    %195 = vector.broadcast %cst_48 : f32 to vector<8x1xf32>
    %196 = tpu.concatenate %194, %195 in 1 : vector<8x255xf32>, vector<8x1xf32> -> vector<8x256xf32>
    %cst_49 = arith.constant 0.000000e+00 : f32
    %197 = vector.shape_cast %9 : vector<1x256xi1> to vector<1x256xi1>
    %198 = vector.broadcast %197 : vector<1x256xi1> to vector<8x256xi1>
    %199 = vector.broadcast %cst_49 : f32 to vector<8x256xf32>
    %200 = arith.select %198, %196, %199 : vector<8x256xi1>, vector<8x256xf32>
    %201 = vector.extract_strided_slice %58 {offsets = [0, 2], sizes = [8, 254], strides = [1, 1]} : vector<8x256xf32> to vector<8x254xf32>
    %cst_50 = arith.constant 0.000000e+00 : f32
    %202 = vector.broadcast %cst_50 : f32 to vector<8x2xf32>
    %203 = tpu.concatenate %201, %202 in 1 : vector<8x254xf32>, vector<8x2xf32> -> vector<8x256xf32>
    %cst_51 = arith.constant 0.000000e+00 : f32
    %204 = vector.shape_cast %144 : vector<1x256xi1> to vector<1x256xi1>
    %205 = vector.broadcast %204 : vector<1x256xi1> to vector<8x256xi1>
    %206 = vector.broadcast %cst_51 : f32 to vector<8x256xf32>
    %207 = arith.select %205, %203, %206 : vector<8x256xi1>, vector<8x256xf32>
    %208 = vector.extract_strided_slice %58 {offsets = [0, 14], sizes = [8, 242], strides = [1, 1]} : vector<8x256xf32> to vector<8x242xf32>
    %cst_52 = arith.constant 0.000000e+00 : f32
    %209 = vector.broadcast %cst_52 : f32 to vector<8x14xf32>
    %210 = tpu.concatenate %208, %209 in 1 : vector<8x242xf32>, vector<8x14xf32> -> vector<8x256xf32>
    %cst_53 = arith.constant 0.000000e+00 : f32
    %211 = vector.shape_cast %115 : vector<1x256xi1> to vector<1x256xi1>
    %212 = vector.broadcast %211 : vector<1x256xi1> to vector<8x256xi1>
    %213 = vector.broadcast %cst_53 : f32 to vector<8x256xf32>
    %214 = arith.select %212, %210, %213 : vector<8x256xi1>, vector<8x256xf32>
    %215 = vector.extract_strided_slice %58 {offsets = [0, 15], sizes = [8, 241], strides = [1, 1]} : vector<8x256xf32> to vector<8x241xf32>
    %cst_54 = arith.constant 0.000000e+00 : f32
    %216 = vector.broadcast %cst_54 : f32 to vector<8x15xf32>
    %217 = tpu.concatenate %215, %216 in 1 : vector<8x241xf32>, vector<8x15xf32> -> vector<8x256xf32>
    %cst_55 = arith.constant 0.000000e+00 : f32
    %218 = vector.shape_cast %20 : vector<1x256xi1> to vector<1x256xi1>
    %219 = vector.broadcast %218 : vector<1x256xi1> to vector<8x256xi1>
    %220 = vector.broadcast %cst_55 : f32 to vector<8x256xf32>
    %221 = arith.select %219, %217, %220 : vector<8x256xi1>, vector<8x256xf32>
    %222 = vector.extract_strided_slice %58 {offsets = [0, 16], sizes = [8, 240], strides = [1, 1]} : vector<8x256xf32> to vector<8x240xf32>
    %cst_56 = arith.constant 0.000000e+00 : f32
    %223 = vector.broadcast %cst_56 : f32 to vector<8x16xf32>
    %224 = tpu.concatenate %222, %223 in 1 : vector<8x240xf32>, vector<8x16xf32> -> vector<8x256xf32>
    %225 = vector.extract_strided_slice %58 {offsets = [0, 17], sizes = [8, 239], strides = [1, 1]} : vector<8x256xf32> to vector<8x239xf32>
    %cst_57 = arith.constant 0.000000e+00 : f32
    %226 = vector.broadcast %cst_57 : f32 to vector<8x17xf32>
    %227 = tpu.concatenate %225, %226 in 1 : vector<8x239xf32>, vector<8x17xf32> -> vector<8x256xf32>
    %cst_58 = arith.constant 0.000000e+00 : f32
    %228 = vector.shape_cast %9 : vector<1x256xi1> to vector<1x256xi1>
    %229 = vector.broadcast %228 : vector<1x256xi1> to vector<8x256xi1>
    %230 = vector.broadcast %cst_58 : f32 to vector<8x256xf32>
    %231 = arith.select %229, %227, %230 : vector<8x256xi1>, vector<8x256xf32>
    %232 = vector.extract_strided_slice %58 {offsets = [0, 18], sizes = [8, 238], strides = [1, 1]} : vector<8x256xf32> to vector<8x238xf32>
    %cst_59 = arith.constant 0.000000e+00 : f32
    %233 = vector.broadcast %cst_59 : f32 to vector<8x18xf32>
    %234 = tpu.concatenate %232, %233 in 1 : vector<8x238xf32>, vector<8x18xf32> -> vector<8x256xf32>
    %cst_60 = arith.constant 0.000000e+00 : f32
    %235 = vector.shape_cast %144 : vector<1x256xi1> to vector<1x256xi1>
    %236 = vector.broadcast %235 : vector<1x256xi1> to vector<8x256xi1>
    %237 = vector.broadcast %cst_60 : f32 to vector<8x256xf32>
    %238 = arith.select %236, %234, %237 : vector<8x256xi1>, vector<8x256xf32>
    %239 = vector.extract_strided_slice %58 {offsets = [0, 30], sizes = [8, 226], strides = [1, 1]} : vector<8x256xf32> to vector<8x226xf32>
    %cst_61 = arith.constant 0.000000e+00 : f32
    %240 = vector.broadcast %cst_61 : f32 to vector<8x30xf32>
    %241 = tpu.concatenate %239, %240 in 1 : vector<8x226xf32>, vector<8x30xf32> -> vector<8x256xf32>
    %cst_62 = arith.constant 0.000000e+00 : f32
    %242 = vector.shape_cast %115 : vector<1x256xi1> to vector<1x256xi1>
    %243 = vector.broadcast %242 : vector<1x256xi1> to vector<8x256xi1>
    %244 = vector.broadcast %cst_62 : f32 to vector<8x256xf32>
    %245 = arith.select %243, %241, %244 : vector<8x256xi1>, vector<8x256xf32>
    %246 = vector.extract_strided_slice %58 {offsets = [0, 31], sizes = [8, 225], strides = [1, 1]} : vector<8x256xf32> to vector<8x225xf32>
    %cst_63 = arith.constant 0.000000e+00 : f32
    %247 = vector.broadcast %cst_63 : f32 to vector<8x31xf32>
    %248 = tpu.concatenate %246, %247 in 1 : vector<8x225xf32>, vector<8x31xf32> -> vector<8x256xf32>
    %cst_64 = arith.constant 0.000000e+00 : f32
    %249 = vector.shape_cast %20 : vector<1x256xi1> to vector<1x256xi1>
    %250 = vector.broadcast %249 : vector<1x256xi1> to vector<8x256xi1>
    %251 = vector.broadcast %cst_64 : f32 to vector<8x256xf32>
    %252 = arith.select %250, %248, %251 : vector<8x256xi1>, vector<8x256xf32>
    %253 = vector.extract_strided_slice %58 {offsets = [0, 32], sizes = [8, 224], strides = [1, 1]} : vector<8x256xf32> to vector<8x224xf32>
    %cst_65 = arith.constant 0.000000e+00 : f32
    %254 = vector.broadcast %cst_65 : f32 to vector<8x32xf32>
    %255 = tpu.concatenate %253, %254 in 1 : vector<8x224xf32>, vector<8x32xf32> -> vector<8x256xf32>
    %256 = vector.extract_strided_slice %58 {offsets = [0, 33], sizes = [8, 223], strides = [1, 1]} : vector<8x256xf32> to vector<8x223xf32>
    %cst_66 = arith.constant 0.000000e+00 : f32
    %257 = vector.broadcast %cst_66 : f32 to vector<8x33xf32>
    %258 = tpu.concatenate %256, %257 in 1 : vector<8x223xf32>, vector<8x33xf32> -> vector<8x256xf32>
    %cst_67 = arith.constant 0.000000e+00 : f32
    %259 = vector.shape_cast %9 : vector<1x256xi1> to vector<1x256xi1>
    %260 = vector.broadcast %259 : vector<1x256xi1> to vector<8x256xi1>
    %261 = vector.broadcast %cst_67 : f32 to vector<8x256xf32>
    %262 = arith.select %260, %258, %261 : vector<8x256xi1>, vector<8x256xf32>
    %263 = vector.extract_strided_slice %58 {offsets = [0, 34], sizes = [8, 222], strides = [1, 1]} : vector<8x256xf32> to vector<8x222xf32>
    %cst_68 = arith.constant 0.000000e+00 : f32
    %264 = vector.broadcast %cst_68 : f32 to vector<8x34xf32>
    %265 = tpu.concatenate %263, %264 in 1 : vector<8x222xf32>, vector<8x34xf32> -> vector<8x256xf32>
    %cst_69 = arith.constant 0.000000e+00 : f32
    %266 = vector.shape_cast %144 : vector<1x256xi1> to vector<1x256xi1>
    %267 = vector.broadcast %266 : vector<1x256xi1> to vector<8x256xi1>
    %268 = vector.broadcast %cst_69 : f32 to vector<8x256xf32>
    %269 = arith.select %267, %265, %268 : vector<8x256xi1>, vector<8x256xf32>
    %270 = tpu.concatenate %119, %126, %129, %136, %148, %155, %162, %165, %172, %179, %186, %193, %58, %200, %207, %214 in 0 : vector<8x256xf32>, vector<8x256xf32>, vector<8x256xf32>, vector<8x256xf32>, vector<8x256xf32>, vector<8x256xf32>, vector<8x256xf32>, vector<8x256xf32>, vector<8x256xf32>, vector<8x256xf32>, vector<8x256xf32>, vector<8x256xf32>, vector<8x256xf32>, vector<8x256xf32>, vector<8x256xf32>, vector<8x256xf32> -> vector<128x256xf32>
    %271 = tpu.concatenate %221, %224, %231, %238, %245, %252, %255, %262, %269 in 0 : vector<8x256xf32>, vector<8x256xf32>, vector<8x256xf32>, vector<8x256xf32>, vector<8x256xf32>, vector<8x256xf32>, vector<8x256xf32>, vector<8x256xf32>, vector<8x256xf32> -> vector<72x256xf32>
    %272 = tpu.concatenate %270, %271 in 0 : vector<128x256xf32>, vector<72x256xf32> -> vector<200x256xf32>
    %273 = tpu.concatenate %107, %272 in 0 : vector<72x256xf32>, vector<200x256xf32> -> vector<272x256xf32>
    %c0_70 = arith.constant 0 : index
    %c0_71 = arith.constant 0 : index
    %274 = vector.load %arg4[%c0_70, %c0_71] : memref<16x272xf32, #tpu.memory_space<vmem>>, vector<16x272xf32>
    %cst_72 = arith.constant dense<0.000000e+00> : vector<16x256xf32>
    %275 = tpu.matmul %274, %273, %cst_72 {dimension_numbers = #tpu.dot_dimension_numbers<[1], [0], [0], [1], [0, 0, 1, 1], [], []>} : vector<16x272xf32>, vector<272x256xf32>, vector<16x256xf32> -> vector<16x256xf32>
    %c0_73 = arith.constant 0 : index
    %c0_74 = arith.constant 0 : index
    %276 = vector.load %arg5[%c0_73, %c0_74] : memref<16x1xf32, #tpu.memory_space<vmem>>, vector<16x1xf32>
    %277 = vector.broadcast %276 : vector<16x1xf32> to vector<16x256xf32>
    %278 = arith.addf %275, %277 : vector<16x256xf32>
    %cst_75 = arith.constant 0.000000e+00 : f32
    %279 = vector.broadcast %cst_75 : f32 to vector<16x256xf32>
    %280 = arith.maximumf %278, %279 : vector<16x256xf32>
    %281 = vector.extract_strided_slice %280 {offsets = [0, 0], sizes = [8, 256], strides = [1, 1]} : vector<16x256xf32> to vector<8x256xf32>
    %282 = vector.extract_strided_slice %280 {offsets = [8, 0], sizes = [8, 256], strides = [1, 1]} : vector<16x256xf32> to vector<8x256xf32>
    %283 = tpu.concatenate %55, %56, %281, %282 in 0 : vector<8x256xf32>, vector<8x256xf32>, vector<8x256xf32>, vector<8x256xf32> -> vector<32x256xf32>
    %c0_76 = arith.constant 0 : index
    %c0_77 = arith.constant 0 : index
    %284 = vector.load %arg6[%c0_76, %c0_77] : memref<8x288xf32, #tpu.memory_space<vmem>>, vector<8x288xf32>
    %cst_78 = arith.constant 0.000000e+00 : f32
    %285 = vector.broadcast %cst_78 : f32 to vector<32x17xf32>
    %286 = vector.extract_strided_slice %283 {offsets = [0, 0], sizes = [32, 239], strides = [1, 1]} : vector<32x256xf32> to vector<32x239xf32>
    %287 = tpu.concatenate %285, %286 in 1 : vector<32x17xf32>, vector<32x239xf32> -> vector<32x256xf32>
    %cst_79 = arith.constant 0.000000e+00 : f32
    %288 = vector.shape_cast %20 : vector<1x256xi1> to vector<1x256xi1>
    %289 = vector.broadcast %288 : vector<1x256xi1> to vector<32x256xi1>
    %290 = vector.broadcast %cst_79 : f32 to vector<32x256xf32>
    %291 = arith.select %289, %287, %290 : vector<32x256xi1>, vector<32x256xf32>
    %cst_80 = arith.constant 0.000000e+00 : f32
    %292 = vector.broadcast %cst_80 : f32 to vector<32x16xf32>
    %293 = vector.extract_strided_slice %283 {offsets = [0, 0], sizes = [32, 240], strides = [1, 1]} : vector<32x256xf32> to vector<32x240xf32>
    %294 = tpu.concatenate %292, %293 in 1 : vector<32x16xf32>, vector<32x240xf32> -> vector<32x256xf32>
    %cst_81 = arith.constant 0.000000e+00 : f32
    %295 = vector.broadcast %cst_81 : f32 to vector<32x15xf32>
    %296 = vector.extract_strided_slice %283 {offsets = [0, 0], sizes = [32, 241], strides = [1, 1]} : vector<32x256xf32> to vector<32x241xf32>
    %297 = tpu.concatenate %295, %296 in 1 : vector<32x15xf32>, vector<32x241xf32> -> vector<32x256xf32>
    %cst_82 = arith.constant 0.000000e+00 : f32
    %298 = vector.shape_cast %9 : vector<1x256xi1> to vector<1x256xi1>
    %299 = vector.broadcast %298 : vector<1x256xi1> to vector<32x256xi1>
    %300 = vector.broadcast %cst_82 : f32 to vector<32x256xf32>
    %301 = arith.select %299, %297, %300 : vector<32x256xi1>, vector<32x256xf32>
    %cst_83 = arith.constant 0.000000e+00 : f32
    %302 = vector.broadcast %cst_83 : f32 to vector<32x1xf32>
    %303 = vector.extract_strided_slice %283 {offsets = [0, 0], sizes = [32, 255], strides = [1, 1]} : vector<32x256xf32> to vector<32x255xf32>
    %304 = tpu.concatenate %302, %303 in 1 : vector<32x1xf32>, vector<32x255xf32> -> vector<32x256xf32>
    %cst_84 = arith.constant 0.000000e+00 : f32
    %305 = vector.shape_cast %20 : vector<1x256xi1> to vector<1x256xi1>
    %306 = vector.broadcast %305 : vector<1x256xi1> to vector<32x256xi1>
    %307 = vector.broadcast %cst_84 : f32 to vector<32x256xf32>
    %308 = arith.select %306, %304, %307 : vector<32x256xi1>, vector<32x256xf32>
    %309 = vector.extract_strided_slice %283 {offsets = [0, 1], sizes = [32, 255], strides = [1, 1]} : vector<32x256xf32> to vector<32x255xf32>
    %cst_85 = arith.constant 0.000000e+00 : f32
    %310 = vector.broadcast %cst_85 : f32 to vector<32x1xf32>
    %311 = tpu.concatenate %309, %310 in 1 : vector<32x255xf32>, vector<32x1xf32> -> vector<32x256xf32>
    %cst_86 = arith.constant 0.000000e+00 : f32
    %312 = vector.shape_cast %9 : vector<1x256xi1> to vector<1x256xi1>
    %313 = vector.broadcast %312 : vector<1x256xi1> to vector<32x256xi1>
    %314 = vector.broadcast %cst_86 : f32 to vector<32x256xf32>
    %315 = arith.select %313, %311, %314 : vector<32x256xi1>, vector<32x256xf32>
    %316 = vector.extract_strided_slice %283 {offsets = [0, 15], sizes = [32, 241], strides = [1, 1]} : vector<32x256xf32> to vector<32x241xf32>
    %cst_87 = arith.constant 0.000000e+00 : f32
    %317 = vector.broadcast %cst_87 : f32 to vector<32x15xf32>
    %318 = tpu.concatenate %316, %317 in 1 : vector<32x241xf32>, vector<32x15xf32> -> vector<32x256xf32>
    %cst_88 = arith.constant 0.000000e+00 : f32
    %319 = vector.shape_cast %20 : vector<1x256xi1> to vector<1x256xi1>
    %320 = vector.broadcast %319 : vector<1x256xi1> to vector<32x256xi1>
    %321 = vector.broadcast %cst_88 : f32 to vector<32x256xf32>
    %322 = arith.select %320, %318, %321 : vector<32x256xi1>, vector<32x256xf32>
    %323 = vector.extract_strided_slice %283 {offsets = [0, 16], sizes = [32, 240], strides = [1, 1]} : vector<32x256xf32> to vector<32x240xf32>
    %cst_89 = arith.constant 0.000000e+00 : f32
    %324 = vector.broadcast %cst_89 : f32 to vector<32x16xf32>
    %325 = tpu.concatenate %323, %324 in 1 : vector<32x240xf32>, vector<32x16xf32> -> vector<32x256xf32>
    %326 = vector.extract_strided_slice %283 {offsets = [0, 17], sizes = [32, 239], strides = [1, 1]} : vector<32x256xf32> to vector<32x239xf32>
    %cst_90 = arith.constant 0.000000e+00 : f32
    %327 = vector.broadcast %cst_90 : f32 to vector<32x17xf32>
    %328 = tpu.concatenate %326, %327 in 1 : vector<32x239xf32>, vector<32x17xf32> -> vector<32x256xf32>
    %cst_91 = arith.constant 0.000000e+00 : f32
    %329 = vector.shape_cast %9 : vector<1x256xi1> to vector<1x256xi1>
    %330 = vector.broadcast %329 : vector<1x256xi1> to vector<32x256xi1>
    %331 = vector.broadcast %cst_91 : f32 to vector<32x256xf32>
    %332 = arith.select %330, %328, %331 : vector<32x256xi1>, vector<32x256xf32>
    %333 = tpu.concatenate %291, %294, %301, %308, %283, %315, %322, %325, %332 in 0 : vector<32x256xf32>, vector<32x256xf32>, vector<32x256xf32>, vector<32x256xf32>, vector<32x256xf32>, vector<32x256xf32>, vector<32x256xf32>, vector<32x256xf32>, vector<32x256xf32> -> vector<288x256xf32>
    %cst_92 = arith.constant dense<0.000000e+00> : vector<8x256xf32>
    %334 = tpu.matmul %284, %333, %cst_92 {dimension_numbers = #tpu.dot_dimension_numbers<[1], [0], [0], [1], [0, 0, 1, 1], [], []>} : vector<8x288xf32>, vector<288x256xf32>, vector<8x256xf32> -> vector<8x256xf32>
    %c0_93 = arith.constant 0 : index
    %c0_94 = arith.constant 0 : index
    %335 = vector.load %arg7[%c0_93, %c0_94] : memref<8x1xf32, #tpu.memory_space<vmem>>, vector<8x1xf32>
    %336 = vector.broadcast %335 : vector<8x1xf32> to vector<8x256xf32>
    %337 = arith.addf %334, %336 : vector<8x256xf32>
    %cst_95 = arith.constant dense<0.000000e+00> : vector<8xf32>
    %338 = vector.multi_reduction <add>, %337, %cst_95 [1] : vector<8x256xf32> to vector<8xf32>
    %339 = vector.shape_cast %338 : vector<8xf32> to vector<8x1xf32>
    %cst_96 = arith.constant 2.560000e+02 : f32
    %340 = vector.broadcast %cst_96 : f32 to vector<8x1xf32>
    %341 = arith.divf %339, %340 : vector<8x1xf32>
    %342 = vector.broadcast %341 : vector<8x1xf32> to vector<8x256xf32>
    %343 = arith.subf %337, %342 : vector<8x256xf32>
    %344 = arith.mulf %343, %343 : vector<8x256xf32>
    %cst_97 = arith.constant dense<0.000000e+00> : vector<8xf32>
    %345 = vector.multi_reduction <add>, %344, %cst_97 [1] : vector<8x256xf32> to vector<8xf32>
    %346 = vector.shape_cast %345 : vector<8xf32> to vector<8x1xf32>
    %347 = tpu.concatenate %341, %346 in 0 : vector<8x1xf32>, vector<8x1xf32> -> vector<16x1xf32>
    %348 = vector.shape_cast %347 : vector<16x1xf32> to vector<1x16x1xf32>
    %c0_98 = arith.constant 0 : index
    %c0_99 = arith.constant 0 : index
    %c0_100 = arith.constant 0 : index
    %349 = vector.load %arg9[%c0_98, %c0_99, %c0_100] : memref<1x16x1xf32, #tpu.memory_space<vmem>>, vector<1x16x1xf32>
    tpu.vector_store %arg9[%c0_98, %c0_99, %c0_100], %348 {strides = array<i32>} : memref<1x16x1xf32, #tpu.memory_space<vmem>>, vector<1x16x1xf32>,
    %350 = vector.shape_cast %337 : vector<8x256xf32> to vector<1x8x256xf32>
    %c0_101 = arith.constant 0 : index
    %c0_102 = arith.constant 0 : index
    %c0_103 = arith.constant 0 : index
    %351 = vector.load %arg8[%c0_101, %c0_102, %c0_103] : memref<1x8x256xf32, #tpu.memory_space<vmem>>, vector<1x8x256xf32>
    tpu.vector_store %arg8[%c0_101, %c0_102, %c0_103], %350 {strides = array<i32>} : memref<1x8x256xf32, #tpu.memory_space<vmem>>, vector<1x8x256xf32>,
    return
  }
  func.func @transform_0(%arg0: i32) -> (i32, i32, i32) {
    %c0_i32 = arith.constant 0 : i32
    %c0_i32_0 = arith.constant 0 : i32
    %c0_i32_1 = arith.constant 0 : i32
    return %arg0, %c0_i32, %c0_i32_0 : i32, i32, i32
  }
  func.func @transform_1(%arg0: i32) -> (i32, i32) {
    %c0_i32 = arith.constant 0 : i32
    %c0_i32_0 = arith.constant 0 : i32
    %c0_i32_1 = arith.constant 0 : i32
    return %c0_i32, %c0_i32_0 : i32, i32
  }
  func.func @transform_2(%arg0: i32) -> (i32, i32) {
    %c0_i32 = arith.constant 0 : i32
    %c0_i32_0 = arith.constant 0 : i32
    %c0_i32_1 = arith.constant 0 : i32
    return %c0_i32, %c0_i32_0 : i32, i32
  }
  func.func @transform_3(%arg0: i32) -> (i32, i32) {
    %c0_i32 = arith.constant 0 : i32
    %c0_i32_0 = arith.constant 0 : i32
    %c0_i32_1 = arith.constant 0 : i32
    return %c0_i32, %c0_i32_0 : i32, i32
  }
  func.func @transform_4(%arg0: i32) -> (i32, i32) {
    %c0_i32 = arith.constant 0 : i32
    %c0_i32_0 = arith.constant 0 : i32
    %c0_i32_1 = arith.constant 0 : i32
    return %c0_i32, %c0_i32_0 : i32, i32
  }
  func.func @transform_5(%arg0: i32) -> (i32, i32) {
    %c0_i32 = arith.constant 0 : i32
    %c0_i32_0 = arith.constant 0 : i32
    %c0_i32_1 = arith.constant 0 : i32
    return %c0_i32, %c0_i32_0 : i32, i32
  }
  func.func @transform_6(%arg0: i32) -> (i32, i32) {
    %c0_i32 = arith.constant 0 : i32
    %c0_i32_0 = arith.constant 0 : i32
    %c0_i32_1 = arith.constant 0 : i32
    return %c0_i32, %c0_i32_0 : i32, i32
  }
  func.func @transform_7(%arg0: i32) -> (i32, i32, i32) {
    %c0_i32 = arith.constant 0 : i32
    %c0_i32_0 = arith.constant 0 : i32
    %c0_i32_1 = arith.constant 0 : i32
    return %arg0, %c0_i32, %c0_i32_0 : i32, i32, i32
  }
  func.func @transform_8(%arg0: i32) -> (i32, i32, i32) {
    %c0_i32 = arith.constant 0 : i32
    %c0_i32_0 = arith.constant 0 : i32
    %c0_i32_1 = arith.constant 0 : i32
    return %arg0, %c0_i32, %c0_i32_0 : i32, i32, i32
  }
}

</mosaic_0001>

<bundles_post_ra>
// kernel: transition_block_pallas.3
= control target key start
LH: loop header
LB: loop body
LE: loop exit
PB: predicated region body
PF: predicated region fallthrough
CT: control target
= control target key end

     0   :  { %s300_s12 = smov 0   ;;  %s323_s0 = inlined_call_operand.vmem [shape: f32[2,8,256], index: 0, kind: input, shape index: {}]   ;;  %s324_s1 = inlined_call_operand.vmem [shape: f32[1,8,1], index: 1, kind: input, shape index: {}]   ;;  %s325_s2 = inlined_call_operand.vmem [shape: f32[1,8,1], index: 2, kind: input, shape index: {}]   ;;  %s326_s3 = inlined_call_operand.vmem [shape: f32[2,8,256], index: 3, kind: output, shape index: {}]  }
   0x1 LB: > { %s248_s13 = sadd.s32 4294967295, %s277_s12   ;;  %p252_p0 = scmp.ge.s32.totalorder %s277_s12, 1  ;;  %s277_s12 = sphi %s300_s12, %s13_s12  }
   0x2   : > { %p137_p1 = scmp.lt.s32.totalorder %s277_s12, 3 }
   0x4   : > { %p138_p2 = pnand %p252_p0, %p137_p1 }
   0x5   : > { %p161_p3 = scmp.lt.s32.totalorder (!%p138_p2), %s248_s13, 1 }
   0x6   : > { %141 = sbr.rel (%p138_p2) target bundleno = 142 (0x8e), region = 32 }
   0xb   : > { %v173_v0 = vld [vmem:[%s324_s1] sm:$0xff]  ;;  %v279_v1 = vmov 0   ;;  %s328_s13 = smov (!%p161_p3, %s248_s13), 1 }
   0xc   : > { %270 = vset.pattern.permute.xlu0 %v279_v1  ;;  %v181_v2 = vld [vmem:[%s325_s2] sm:$0xff]  ;;  %s259_s18 = sshll.u32 %s328_s13, 4 }
   0xd   : > { %176 = vperm.xlu0 %270, %v173_v0   ;;  %s165_s21 = scalar_lea.vmem %s323_s0, %s259_s18  ;;  %s170_s24 = scalar_lea.vmem %s326_s3, %s259_s18 }
   0xe   : > { %v171_v4 = vld [vmem:[%s165_s21] sm:$0xff]  ;;  %v172_v5 = vld [vmem:[%s165_s21 + $0x8] sm:$0xff] }
  0x15   : > { %184 = vperm.xlu0 %270, %v181_v2  }
  0x7f   : > { %v177_v3 = vpop.permute.xlu0 %176 }
  0x80   : > { %v179_v6 = vmul.f32 %v177_v3, %v171_v4  ;;  %v180_v7 = vmul.f32 %v177_v3, %v172_v5 }
  0x87   : > { %v185_v8 = vpop.permute.xlu0 %184 }
  0x88   : > { %v187_v9 = vadd.f32 %v185_v8, %v179_v6  ;;  %v188_v10 = vadd.f32 %v185_v8, %v180_v7 }
  0x8a   : > { %v189_v11 = vmax.f32 %v187_v9, 0.0  ;;  %v190_v12 = vmax.f32 %v188_v10, 0.0 }
  0x8c   : > { %191 = vst [vmem:[%s170_s24] sm:$0xff] %v189_v11 }
  0x8d   : > { %192 = vst [vmem:[%s170_s24 + $0x8] sm:$0xff] %v190_v12 }
  0x8e PF: > { %s13_s12 = sadd.s32 1, %s277_s12  }
  0x8f   : > { %p10_p4 = scmp.ge.s32.totalorder %s13_s12, 4  }
  0x91   :  { %12 = sbr.rel (!%p10_p4) target bundleno = 1 (0x1), region = 62 }

// kernel: transition_block_pallas.2
= control target key start
LH: loop header
LB: loop body
LE: loop exit
PB: predicated region body
PF: predicated region fallthrough
CT: control target
= control target key end

     0   :  { %s1952_s27 = smov 0   ;;  %s2997_s0 = inlined_call_operand.vmem [shape: f32[2,4,256], index: 0, kind: input, shape index: {}]   ;;  %s2998_s1 = inlined_call_operand.vmem [shape: f32[32,8], index: 1, kind: input, shape index: {}]   ;;  %s2999_s2 = inlined_call_operand.vmem [shape: f32[32,1], index: 2, kind: input, shape index: {}]   ;;  %s3000_s3 = inlined_call_operand.vmem [shape: f32[16,272], index: 3, kind: input, shape index: {}]   ;;  %s3001_s4 = inlined_call_operand.vmem [shape: f32[16,1], index: 4, kind: input, shape index: {}]   ;;  %s3002_s5 = inlined_call_operand.vmem [shape: f32[8,288], index: 5, kind: input, shape index: {}]   ;;  %s3003_s6 = inlined_call_operand.vmem [shape: f32[8,1], index: 6, kind: input, shape index: {}]   ;;  %s3004_s7 = inlined_call_operand.vmem [shape: f32[2,8,256], index: 7, kind: output, shape index: {0}]   ;;  %s3005_s8 = inlined_call_operand.vmem [shape: f32[2,16,1], index: 8, kind: output, shape index: {1}]  }
   0x1 LB: > { %s1653_s28 = sadd.s32 4294967295, %s1879_s27   ;;  %p1657_p0 = scmp.ge.s32.totalorder %s1879_s27, 1  ;;  %s1879_s27 = sphi %s1952_s27, %s19_s27  }
   0x2   : > { %p265_p1 = scmp.lt.s32.totalorder %s1879_s27, 3 }
   0x4   : > { %p266_p2 = pnand %p1657_p0, %p265_p1 }
   0x5   : > { %p304_p3 = scmp.lt.s32.totalorder (!%p266_p2), %s1653_s28, 1  ;;  %s1881_s11 = smov (!%p266_p2), 127  }
   0x6   : > { %269 = sbr.rel (%p266_p2) target bundleno = 1463 (0x5b7), region = 48  ;;  %s1882_s12 = smov (!%p266_p2), 1  }
   0x7   : > { %s1883_s13 = smov (!%p266_p2), 112   ;;  %s1884_s14 = smov (!%p266_p2), 16  }
   0x8   : > { %s1887_s30 = smov (!%p266_p2), 111   ;;  %s1888_s9 = smov (!%p266_p2), 15  }
   0x9   : > { %s1890_s15 = smov (!%p266_p2), 17   ;;  %s1891_s16 = smov (!%p266_p2), 31  }
   0xa   : > { %s1892_s17 = smov (!%p266_p2), 18   ;;  %s1893_s18 = smov (!%p266_p2), 110  }
   0xb   : > { %s3121_s28 = smov (!%p304_p3, %s1653_s28), 1  ;;  %v320_v7 = vlaneseq  ;;  %vm339_vm0 = vcmask 1039360   ;;  %vm387_vm3 = vcmask 1043456   ;;  %vm368_vm4 = vcmask 7168   ;;  %v480_v56 = vld [vmem:[%s2999_s2 + $0x10] sm:$0xff]  ;;  %v481_v57 = vld [vmem:[%s2999_s2 + $0x18] sm:$0xff] }
   0xc   : > { %s1801_s29 = sshll.u32 %s3121_s28, 3  ;;  %vm407_vm7 = vcmask 916480   ;;  %vm3017_vm9 = vcmask 130048   ;;  %v1885_v58 = vmov 0   ;;  %v474_v59 = vld [vmem:[%s2998_s1] sm:$0xff]  ;;  %vm502_vm11 = vcmask 64512  }
   0xd   : > { %s308_s10 = scalar_lea.vmem %s2997_s0, %s1801_s29  ;;  %v1976_v8 = vand.u32 127, %v320_v7  ;;  %1839 = vset.pattern.permute.xlu0 %v1885_v58  ;;  %1838 = vset.pattern.permute.xlu2 %v1885_v58  ;;  %s1886_s29 = smov 113   ;;  %vm637_vm12 = vcmask 924672   ;;  %vm3019_vm13 = vcmask 121856   ;;  %vm3020_vm14 = vcmask 138240  }
   0xe   : > { %v1966_v0 = vld [vmem:[%s308_s10] sm:$0xff]  ;;  %1850 = vset.pattern.permute.xlu1 %v1885_v58  ;;  %s1889_s10 = smov 30   ;;  %s1894_s19 = smov 96   ;;  %vm3007_vm15 = vcmask 146432  }
   0xf   : > { %332 = vst [vmem:[#allocation1] ss:$2 sm:$0xff] %v1966_v0  ;;  %v322_v10 = vadd.s32 128, %v1976_v8  ;;  %v1984_v13 = vand.u32 15, %v1976_v8  ;;  %vm423_vm10 = vcmp.ge.s32.totalorder %v1976_v8, 16  ;;  %s1895_s20 = smov 33  }
  0x10   : > { %s1896_s21 = smov 97   ;;  %s1897_s22 = smov 34  }
  0x11   : > { %v1979_v11 = vand.u32 15, %v322_v10  ;;  %vm3018_vm2 = vcmp.lt.s32.totalorder %v1984_v13, 15  ;;  %vm355_vm6 = vcmp.ge.s32.totalorder %v1984_v13, 1  ;;  %vm398_vm8 = vcmp.lt.s32.totalorder %v322_v10, 240  ;;  %s1898_s23 = smov 98   ;;  %s1899_s24 = smov 32  }
  0x12   : > { %s1900_s25 = smov 114   ;;  %s1901_s26 = smov 126  }
  0x13   : > { %vm3006_vm1 = vcmp.lt.s32.totalorder %v1979_v11, 15  ;;  %vm3008_vm5 = vcmp.ge.s32.totalorder %v1979_v11, 1 }
  0x16   : > { %v334_v1 = vld.sshfl [vmem:[#allocation1 + $0x8] sm:$0xff pattern:$0x75316420]  ;;  %v333_v2 = vld.sshfl [vmem:[#allocation1] sm:$0xff pattern:$0x75316420] }
  0x17   : > { %337 = vrot.lane.b32.xlu0 %v334_v1, %s1881_s11  ;;  %348 = vst [vmem:[#allocation1] ss:$2 sm:$0xff] %v1966_v0  ;;  %v476_v1 = vld [vmem:[%s2998_s1 + $0x10] sm:$0xff] }
  0x1e   : > { %v349_v3 = vld.sshfl [vmem:[#allocation1] sm:$0xff pattern:$0x75316420]  ;;  %v350_v4 = vld.sshfl [vmem:[#allocation1 + $0x8] sm:$0xff pattern:$0x75316420] }
  0x1f   : > { %335 = vrot.lane.b32.xlu0 %v333_v2, %s1881_s11  ;;  %361 = vst [vmem:[#allocation1] ss:$2 sm:$0xff] %v1966_v0  ;;  %v477_v2 = vld [vmem:[%s2998_s1 + $0x18] sm:$0xff] }
  0x26   : > { %v362_v5 = vld.sshfl [vmem:[#allocation1] sm:$0xff pattern:$0x75316420]  ;;  %v363_v6 = vld.sshfl [vmem:[#allocation1 + $0x8] sm:$0xff pattern:$0x75316420] }
  0x27   : > { %364 = vrot.lane.b32.xlu1 %v362_v5, %s1882_s12  ;;  %377 = vst [vmem:[#allocation1] ss:$2 sm:$0xff] %v1966_v0 }
  0x2e   : > { %v379_v20 = vld.sshfl [vmem:[#allocation1 + $0x8] sm:$0xff pattern:$0x75316420]  ;;  %v378_v24 = vld.sshfl [vmem:[#allocation1] sm:$0xff pattern:$0x75316420] }
  0x2f   : > { %366 = vrot.lane.b32.xlu1 %v363_v6, %s1882_s12 }
  0x89   : > { %v338_v9 = vpop.permute.xlu0 %337 }
  0x8a   : > { %v343_v12 = vsel %vm339_vm0, %v338_v9, 0.0 }
  0x8b   : > { %v354_v16 = vsel %vm3006_vm1, %v343_v12, %v350_v4  ;;  %vm3010_vm1 = vcmask 261120  }
  0x8c   : > { %v386_v18 = vrot.slane %v354_v16, 4 }
  0x91   : > { %v336_v14 = vpop.permute.xlu0 %335 }
  0x92   : > { %v340_v17 = vsel %vm339_vm0, %v336_v14, %v338_v9 }
  0x93   : > { %v353_v19 = vsel %vm3018_vm2, %v340_v17, %v349_v3 }
  0x94   : > { %v388_v22 = vsel %vm387_vm3, %v353_v19, %v386_v18 }
  0x95   : > { %v390_v28 = vmax.f32 %v1966_v0, %v388_v22 }
  0x99   : > { %v365_v15 = vpop.permute.xlu1 %364 }
  0x9a   : > { %v372_v23 = vsel %vm368_vm4, 0.0, %v365_v15 }
  0x9b   : > { %v382_v29 = vsel %vm355_vm6, %v372_v23, %v378_v24 }
  0xa1   : > { %v367_v21 = vpop.permute.xlu1 %366 }
  0xa2   : > { %v369_v25 = vsel %vm368_vm4, %v365_v15, %v367_v21 }
  0xa3   : > { %v383_v26 = vsel %vm3008_vm5, %v369_v25, %v379_v20  ;;  %vm1676_vm5 = vmneg %vm3010_vm1  ;;  %vm669_vm1 = vcmask 277504  }
  0xa4   : > { %v393_v27 = vrot.slane %v383_v26, 4 }
  0xa6   : > { %v394_v30 = vsel %vm387_vm3, %v382_v29, %v393_v27 }
  0xa7   : > { %v396_v31 = vmax.f32 %v390_v28, %v394_v30 }
  0xa9   : > { %400 = vst [vmem:[#allocation1] ss:$2 sm:$0xff] %v396_v31 }
  0xb0   : > { %v402_v32 = vld.sshfl [vmem:[#allocation1 + $0x8] sm:$0xff pattern:$0x75316420]  ;;  %v401_v33 = vld.sshfl [vmem:[#allocation1] sm:$0xff pattern:$0x75316420] }
  0xb1   : > { %405 = vrot.lane.b32.xlu2 %v402_v32, %s1883_s13  ;;  %416 = vst [vmem:[#allocation1] ss:$2 sm:$0xff] %v396_v31 }
  0xb8   : > { %v418_v34 = vld.sshfl [vmem:[#allocation1 + $0x8] sm:$0xff pattern:$0x75316420] }
  0xb9   : > { %403 = vrot.lane.b32.xlu2 %v401_v33, %s1883_s13  ;;  %425 = vst [vmem:[#allocation1] ss:$2 sm:$0xff] %v396_v31 }
  0xc0   : > { %v427_v35 = vld.sshfl [vmem:[#allocation1 + $0x8] sm:$0xff pattern:$0x75316420]  ;;  %v426_v36 = vld.sshfl [vmem:[#allocation1] sm:$0xff pattern:$0x75316420] }
  0xc1   : > { %430 = vrot.lane.b32.xlu1 %v427_v35, %s1884_s14  ;;  %428 = vrot.lane.b32.xlu0 %v426_v36, %s1884_s14  ;;  %441 = vst [vmem:[#allocation1] ss:$2 sm:$0xff] %v396_v31 }
  0xc2   : > { %499 = vperm.xlu2 %1838, %v481_v57  }
  0xc8   : > { %v442_v37 = vld.sshfl [vmem:[#allocation1] sm:$0xff pattern:$0x75316420] }
  0xc9   : > { %460 = vst [vmem:[#allocation1] ss:$2 sm:$0xff] %v1966_v0  ;;  %494 = vperm.xlu0 %1839, %v480_v56   ;;  %v475_v0 = vld [vmem:[%s2998_s1 + $0x8] sm:$0xff] }
  0xd0   : > { %v462_v53 = vld.sshfl [vmem:[#allocation1 + $0x8] sm:$0xff pattern:$0x75316420]  ;;  %v461_v54 = vld.sshfl [vmem:[#allocation1] sm:$0xff pattern:$0x75316420] }
 0x10b   : > { %v406_v38 = vpop.permute.xlu2 %405 }
 0x10c   : > { %v411_v39 = vsel %vm407_vm7, %v406_v38, 0.0 }
 0x10d   : > { %v422_v41 = vsel %vm398_vm8, %v411_v39, %v418_v34  ;;  %vm3009_vm8 = vcmask 244736  }
 0x10e   : > { %v450_v43 = vrot.slane %v422_v41, 4 }
 0x113   : > { %v404_v40 = vpop.permute.xlu2 %403 }
 0x114   : > { %v408_v42 = vsel %vm407_vm7, %v404_v40, %v406_v38 }
 0x115   : > { %v451_v44 = vsel %vm387_vm3, %v408_v42, %v450_v43 }
 0x116   : > { %v453_v51 = vmax.f32 %v396_v31, %v451_v44 }
 0x11c   : > { %v500_v16 = vpop.permute.xlu2 %499 }
 0x133   : > { %v431_v45 = vpop.permute.xlu1 %430  ;;  %v429_v46 = vpop.permute.xlu0 %428 }
 0x134   : > { %v433_v47 = vsel %vm3017_vm9, %v429_v46, %v431_v45  ;;  %v436_v48 = vsel %vm3017_vm9, 0.0, %v429_v46 }
 0x135   : > { %v446_v49 = vsel %vm423_vm10, %v436_v48, %v442_v37  ;;  %v456_v50 = vrot.slane %v433_v47, 4  ;;  %vm728_vm10 = vcmp.lt.s32.totalorder %v1984_v13, 14 }
 0x137   : > { %v457_v52 = vsel %vm387_vm3, %v446_v49, %v456_v50 }
 0x138   : > { %v459_v55 = vmax.f32 %v453_v51, %v457_v52  ;;  %v479_v52 = vld [vmem:[%s2999_s2 + $0x8] sm:$0xff] }
 0x13a   : > { %467 = vst [vmem:[#allocation1 + $0x1] ss:$2 sm:$0xff] %v459_v55 }
 0x13b   : > { %v495_v7 = vpop.permute.xlu0 %494 }
 0x141   : > { %v468_v60 = vld.sshfl [vmem:[#allocation1] sm:$0xff pattern:$0x75316420]  ;;  %v469_v61 = vld.sshfl [vmem:[#allocation1 + $0x8] sm:$0xff pattern:$0x75316420] }
 0x142   : > { %v472_v62 = vsel %vm387_vm3, %v461_v54, %v468_v60  ;;  %v473_v63 = vsel %vm387_vm3, %v462_v53, %v469_v61  ;;  %vm3016_vm3 = vcmp.ge.s32.totalorder %v1984_v13, 2  ;;  %v940_v60 = vld [vmem:[%s3001_s4 + $0x8] sm:$0xff] }
 0x143   : > { %530 = vmatpush.msra.mxu0 %v472_v62  ;;  %559 = vmatpush.msra.mxu1 %v473_v63 }
 0x144   : > { %1664 = vmatmul.msk.f32.vlgmr.msra.gmra.mxu0 %vm502_vm11, %v474_v59  ;;  %1668 = vmatmul.msk.f32.vlgmr.msra.gmra.mxu1 %vm502_vm11, %v474_v59  ;;  %v939_v59 = vld [vmem:[%s3001_s4] sm:$0xff] }
 0x14c   : > { %1665 = vmatmul.msk.f32.gmra.mxu0 %vm502_vm11, %v475_v0  ;;  %1669 = vmatmul.msk.f32.gmra.mxu1 %vm502_vm11, %v475_v0 }
 0x154   : > { %1666 = vmatmul.msk.f32.gmra.mxu0 %vm502_vm11, %v476_v1  ;;  %1670 = vmatmul.msk.f32.gmra.mxu1 %vm502_vm11, %v476_v1 }
 0x15c   : > { %1667 = vmatmul.msk.f32.gmra.mxu0 %vm502_vm11, %v477_v2  ;;  %1671 = vmatmul.msk.f32.gmra.mxu1 %vm502_vm11, %v477_v2  ;;  %vm3011_vm11 = vcmask 252928  }
 0x1c1   : > { %v2043_v3 = vpop.f32.mrf.mxu0  ;;  %v2045_v4 = vpop.f32.mrf.mxu1 }
 0x1c9   : > { %v2047_v5 = vpop.f32.mrf.mxu0  ;;  %v2049_v6 = vpop.f32.mrf.mxu1 }
 0x1d1   : > { %v538_v8 = vpop.f32.mrf.mxu0  ;;  %v567_v9 = vpop.f32.mrf.mxu1 }
 0x1d2   : > { %v539_v10 = vadd.f32 %v538_v8, %v495_v7  ;;  %v568_v12 = vadd.f32 %v567_v9, %v495_v7  ;;  %v478_v7 = vld [vmem:[%s2999_s2] sm:$0xff] }
 0x1d4   : > { %v2051_v14 = vmax.f32 %v539_v10, 0.0  ;;  %v2053_v15 = vmax.f32 %v568_v12, 0.0 }
 0x1d6   : > { %635 = vrot.lane.b32.xlu2 %v2053_v15, %s1886_s29  ;;  %654 = vrot.lane.b32.xlu1 %v2053_v15, %s1887_s30 }
 0x1d7   : > { %652 = vrot.lane.b32.xlu0 %v2051_v14, %s1887_s30 }
 0x1d9   : > { %v541_v17 = vpop.f32.mrf.mxu0  ;;  %v570_v20 = vpop.f32.mrf.mxu1 }
 0x1da   : > { %v542_v18 = vadd.f32 %v541_v17, %v500_v16  ;;  %v571_v21 = vadd.f32 %v570_v20, %v500_v16 }
 0x1dc   : > { %v2073_v19 = vmax.f32 %v542_v18, 0.0  ;;  %v2092_v22 = vmax.f32 %v571_v21, 0.0 }
 0x1de   : > { %646 = vrot.lane.b32.xlu1 %v2053_v15, %s1883_s13  ;;  %623 = vrot.lane.b32.xlu2 %v2051_v14, %s1881_s11  ;;  %v1840_v23 = vpack.i.bf16 %v2051_v14, %v2073_v19  ;;  %v1845_v46 = vpack.i.bf16 %v2053_v15, %v2092_v22 }
 0x1df   : > { %625 = vrot.lane.b32.xlu0 %v2053_v15, %s1881_s11 }
 0x1e6   : > { %613 = vrot.lane.b32.xlu2 %v2051_v14, %s1882_s12  ;;  %633 = vrot.lane.b32.xlu1 %v2051_v14, %s1886_s29 }
 0x1e7   : > { %604 = vrot.lane.b32.xlu0 %v2053_v15, %s1888_s9 }
 0x1ee   : > { %602 = vrot.lane.b32.xlu2 %v2051_v14, %s1888_s9  ;;  %594 = vrot.lane.b32.xlu1 %v2051_v14, %s1884_s14 }
 0x1ef   : > { %717 = vrot.lane.b32.xlu0 %v2073_v19, %s1889_s10 }
 0x1f6   : > { %583 = vrot.lane.b32.xlu2 %v2051_v14, %s1890_s15  ;;  %615 = vrot.lane.b32.xlu1 %v2053_v15, %s1882_s12 }
 0x1f7   : > { %706 = vrot.lane.b32.xlu0 %v2073_v19, %s1891_s16 }
 0x1fe   : > { %738 = vrot.lane.b32.xlu2 %v2073_v19, %s1892_s17  ;;  %749 = vrot.lane.b32.xlu1 %v2073_v19, %s1890_s15 }
 0x1ff   : > { %869 = vrot.lane.b32.xlu0 %v2073_v19, %s1893_s18 }
 0x206   : > { %904 = vrot.lane.b32.xlu2 %v2092_v22, %s1894_s19  ;;  %902 = vrot.lane.b32.xlu1 %v2073_v19, %s1894_s19 }
 0x207   : > { %686 = vrot.lane.b32.xlu0 %v2073_v19, %s1895_s20 }
 0x20e   : > { %893 = vrot.lane.b32.xlu2 %v2092_v22, %s1896_s21  ;;  %891 = vrot.lane.b32.xlu1 %v2073_v19, %s1896_s21 }
 0x20f   : > { %665 = vrot.lane.b32.xlu0 %v2073_v19, %s1897_s22 }
 0x216   : > { %882 = vrot.lane.b32.xlu2 %v2092_v22, %s1898_s23  ;;  %880 = vrot.lane.b32.xlu1 %v2073_v19, %s1898_s23 }
 0x217   : > { %843 = vrot.lane.b32.xlu0 %v2092_v22, %s1886_s29 }
 0x21e   : > { %697 = vrot.lane.b32.xlu2 %v2073_v19, %s1899_s24  ;;  %871 = vrot.lane.b32.xlu1 %v2092_v22, %s1893_s18  ;;  %s1902_s18 = smov 14  }
 0x21f   : > { %832 = vrot.lane.b32.xlu0 %v2092_v22, %s1900_s25 }
 0x226   : > { %861 = vrot.lane.b32.xlu2 %v2092_v22, %s1887_s30  ;;  %859 = vrot.lane.b32.xlu1 %v2073_v19, %s1887_s30 }
 0x227   : > { %819 = vrot.lane.b32.xlu0 %v2073_v19, %s1901_s26 }
 0x22e   : > { %853 = vrot.lane.b32.xlu2 %v2092_v22, %s1883_s13  ;;  %1841 = vrot.lane.b32.xlu1 %v1840_v23, %s1883_s13 }
 0x22f   : > { %811 = vrot.lane.b32.xlu0 %v2092_v22, %s1881_s11 }
 0x230   : > { %v2121_v24 = vpop.permute.xlu2 %635 }
 0x236   : > { %841 = vrot.lane.b32.xlu2 %v2073_v19, %s1886_s29  ;;  %821 = vrot.lane.b32.xlu1 %v2092_v22, %s1901_s26 }
 0x237   : > { %719 = vrot.lane.b32.xlu0 %v2092_v22, %s1889_s10  ;;  %s1903_s10 = smov 2  }
 0x238   : > { %v624_v25 = vpop.permute.xlu2 %623 }
 0x23e   : > { %830 = vrot.lane.b32.xlu2 %v2073_v19, %s1900_s25  ;;  %751 = vrot.lane.b32.xlu1 %v2092_v22, %s1890_s15 }
 0x23f   : > { %708 = vrot.lane.b32.xlu0 %v2092_v22, %s1891_s16  ;;  %s1904_s16 = smov 95  }
 0x240   : > { %v2133_v26 = vpop.permute.xlu2 %613 }
 0x246   : > { %809 = vrot.lane.b32.xlu2 %v2073_v19, %s1881_s11  ;;  %740 = vrot.lane.b32.xlu1 %v2092_v22, %s1892_s17  ;;  %s1905_s17 = smov 94  }
 0x247   : > { %777 = vrot.lane.b32.xlu0 %v2073_v19, %s1902_s18 }
 0x248   : > { %v2140_v27 = vpop.permute.xlu1 %654  ;;  %v2142_v28 = vpop.permute.xlu2 %602 }
 0x249   : > { %v2144_v29 = vpop.permute.xlu0 %652 }
 0x24e   : > { %699 = vrot.lane.b32.xlu2 %v2092_v22, %s1899_s24  ;;  %799 = vrot.lane.b32.xlu1 %v2073_v19, %s1882_s12 }
 0x24f   : > { %688 = vrot.lane.b32.xlu0 %v2092_v22, %s1895_s20 }
 0x250   : > { %v2151_v30 = vpop.permute.xlu1 %646  ;;  %v2153_v31 = vpop.permute.xlu2 %583 }
 0x251   : > { %v2155_v32 = vpop.permute.xlu0 %625 }
 0x252   : > { %v2159_v33 = vsel %vm339_vm0, %v624_v25, %v2155_v32 }
 0x256   : > { %667 = vrot.lane.b32.xlu2 %v2092_v22, %s1897_s22  ;;  %788 = vrot.lane.b32.xlu1 %v2073_v19, %s1903_s10 }
 0x257   : > { %759 = vrot.lane.b32.xlu0 %v2073_v19, %s1884_s14 }
 0x258   : > { %v2166_v34 = vpop.permute.xlu2 %738  ;;  %v634_v35 = vpop.permute.xlu1 %633 }
 0x259   : > { %v605_v36 = vpop.permute.xlu0 %604  ;;  %v2170_v37 = vsel %vm637_vm12, %v634_v35, %v2121_v24  ;;  %v746_v51 = vsel %vm3007_vm15, 0.0, %v2166_v34  ;;  %vm906_vm15 = vcmask 785408  }
 0x25a   : > { %v2174_v38 = vsel %vm3019_vm13, %v2142_v28, %v605_v36 }
 0x25e   : > { %790 = vrot.lane.b32.xlu2 %v2092_v22, %s1903_s10  ;;  %767 = vrot.lane.b32.xlu1 %v2073_v19, %s1888_s9 }
 0x25f   : > { %779 = vrot.lane.b32.xlu0 %v2092_v22, %s1902_s18  ;;  %s1802_s18 = sshll.u32 %s3121_s28, 4 }
 0x260   : > { %v2180_v39 = vpop.permute.xlu2 %904  ;;  %v2182_v40 = vpop.permute.xlu1 %594  ;;  %s318_s20 = scalar_lea.vmem %s3005_s8, %s1802_s18 }
 0x261   : > { %v2184_v41 = vpop.permute.xlu0 %717 }
 0x262   : > { %v725_v53 = vsel %vm3009_vm8, 0.0, %v2184_v41  ;;  %vm3012_vm8 = vcmask 269312  }
 0x266   : > { %769 = vrot.lane.b32.xlu2 %v2092_v22, %s1888_s9  ;;  %801 = vrot.lane.b32.xlu1 %v2092_v22, %s1882_s12 }
 0x267   : > { %913 = vrot.lane.b32.xlu0 %v2092_v22, %s1904_s16 }
 0x268   : > { %v2191_v42 = vpop.permute.xlu2 %893  ;;  %v616_v43 = vpop.permute.xlu1 %615 }
 0x269   : > { %v2193_v44 = vpop.permute.xlu0 %706  ;;  %v2197_v45 = vsel %vm368_vm4, %v2133_v26, %v616_v43 }
 0x26a   : > { %v714_v56 = vsel %vm3011_vm11, 0.0, %v2193_v44  ;;  %vm3014_vm11 = vcmask 908288  }
 0x26b   : > { %v657_v8 = vsel %vm3014_vm11, %v2144_v29, %v2140_v27 }
 0x26e   : > { %924 = vrot.lane.b32.xlu2 %v2092_v22, %s1905_s17  ;;  %1846 = vrot.lane.b32.xlu1 %v1845_v46, %s1884_s14 }
 0x26f   : > { %911 = vrot.lane.b32.xlu0 %v2073_v19, %s1904_s16 }
 0x270   : > { %v2204_v47 = vpop.permute.xlu2 %882  ;;  %v2206_v48 = vpop.permute.xlu1 %749 }
 0x271   : > { %v870_v49 = vpop.permute.xlu0 %869  ;;  %v756_v50 = vsel %vm3020_vm14, 0.0, %v2206_v48 }
 0x272   : > { %1672 = vmatpush.msk.msra.mxu2 %vm355_vm6, %v756_v50 }
 0x274   : > { %1673 = vmatpush.msk.msra.mxu2 %vm3016_vm3, %v746_v51 }
 0x276   : > { %922 = vrot.lane.b32.xlu2 %v2073_v19, %s1905_s17  ;;  %585 = vrot.lane.b32.xlu1 %v2053_v15, %s1890_s15  ;;  %s313_s17 = scalar_lea.vmem %s3004_s7, %s1802_s18 }
 0x277   : > { %489 = vperm.xlu0 %1839, %v479_v52   ;;  %1674 = vmatpush.msk.msra.mxu2 %vm728_vm10, %v725_v53 }
 0x278   : > { %v2228_v54 = vpop.permute.xlu2 %697  ;;  %v903_v55 = vpop.permute.xlu1 %902 }
 0x279   : > { %1675 = vmatpush.msk.msra.mxu2 %vm3018_vm2, %v714_v56  ;;  %v2235_v57 = vpop.permute.xlu0 %686  ;;  %v907_v58 = vsel %vm906_vm15, %v903_v55, %v2180_v39 }
 0x27a   : > { %980 = vmatpush.msra.mxu3 %v907_v58  ;;  %v694_v61 = vsel %vm3012_vm8, 0.0, %v2235_v57  ;;  %vm884_vm8 = vcmask 801792  }
 0x27b   : > { %1677 = vmatpush.msk.msra.mxu2 %vm1676_vm5, %v2228_v54  ;;  %vm3013_vm5 = vcmask 793600  }
 0x27d   : > { %1678 = vmatpush.msk.msra.mxu2 %vm355_vm6, %v694_v61 }
 0x27e   : > { %943 = vperm.xlu2 %1838, %v939_v59   ;;  %948 = vperm.xlu1 %1850, %v940_v60   ;;  %v620_v60 = vsel %vm368_vm4, 0.0, %v2133_v26 }
 0x280   : > { %v2250_v62 = vpop.permute.xlu2 %861  ;;  %v892_v63 = vpop.permute.xlu1 %891 }
 0x281   : > { %v2252_v0 = vpop.permute.xlu0 %665  ;;  %v896_v1 = vsel %vm3013_vm5, %v892_v63, %v2191_v42  ;;  %vm3015_vm5 = vcmask 900096  }
 0x282   : > { %v673_v2 = vsel %vm669_vm1, 0.0, %v2252_v0  ;;  %1688 = vmatpush.msk.msra.mxu3 %vm355_vm6, %v896_v1 }
 0x283   : > { %1679 = vmatpush.msk.msra.mxu2 %vm3016_vm3, %v673_v2  ;;  %v591_v2 = vsel %vm3020_vm14, 0.0, %v2153_v31 }
 0x285   : > { %1680 = vmatpush.msk.msra.mxu2 %vm3018_vm2, %v657_v8 }
 0x286   : > { %484 = vperm.xlu1 %1850, %v478_v7  }
 0x288   : > { %v2270_v9 = vpop.permute.xlu2 %853  ;;  %v881_v10 = vpop.permute.xlu1 %880 }
 0x289   : > { %v2272_v12 = vpop.permute.xlu0 %843  ;;  %v885_v16 = vsel %vm884_vm8, %v881_v10, %v2204_v47 }
 0x28a   : > { %1689 = vmatpush.msk.msra.mxu3 %vm3016_vm3, %v885_v16 }
 0x290   : > { %v842_v17 = vpop.permute.xlu2 %841  ;;  %v872_v18 = vpop.permute.xlu1 %871 }
 0x291   : > { %v2278_v20 = vpop.permute.xlu0 %832  ;;  %v874_v21 = vsel %vm3015_vm5, %v870_v49, %v872_v18  ;;  %v845_v53 = vsel %vm637_vm12, %v842_v17, %v2272_v12  ;;  %vm823_vm5 = vcmask 1031168  }
 0x292   : > { %1690 = vmatpush.msk.msra.mxu3 %vm728_vm10, %v874_v21 }
 0x298   : > { %v831_v23 = vpop.permute.xlu2 %830  ;;  %v860_v25 = vpop.permute.xlu1 %859 }
 0x299   : > { %v820_v29 = vpop.permute.xlu0 %819  ;;  %v863_v35 = vsel %vm3014_vm11, %v860_v25, %v2250_v62  ;;  %vm834_vm11 = vcmask 932864  }
 0x29a   : > { %1691 = vmatpush.msk.msra.mxu3 %vm3018_vm2, %v863_v35  ;;  %v835_v55 = vsel %vm834_vm11, %v831_v23, %v2278_v20 }
 0x2a0   : > { %v810_v36 = vpop.permute.xlu2 %809  ;;  %v1842_v43 = vpop.permute.xlu1 %1841 }
 0x2a1   : > { %v1844_v46 = vunpack.i.h.bf16 %v1842_v43  ;;  %v1843_v50 = vunpack.i.l.bf16 %v1842_v43  ;;  %v2287_v51 = vpop.permute.xlu0 %811 }
 0x2a2   : > { %v813_v61 = vsel %vm339_vm0, %v810_v36, %v2287_v51 }
 0x2a3   : > { %v648_v49 = vsel %vm407_vm7, %v1844_v46, %v2151_v30  ;;  %v855_v52 = vsel %vm407_vm7, %v1843_v50, %v2270_v9 }
 0x2a4   : > { %965 = vmatpush.msra.mxu2 %v648_v49  ;;  %985 = vmatpush.msra.mxu3 %v855_v52 }
 0x2a6   : > { %1681 = vmatpush.msk.msra.mxu2 %vm355_vm6, %v2170_v37  ;;  %1692 = vmatpush.msk.msra.mxu3 %vm355_vm6, %v845_v53 }
 0x2a8   : > { %v700_v56 = vpop.permute.xlu2 %699  ;;  %v822_v58 = vpop.permute.xlu1 %821  ;;  %1682 = vmatpush.msk.msra.mxu2 %vm3018_vm2, %v2159_v33  ;;  %1693 = vmatpush.msk.msra.mxu3 %vm3016_vm3, %v835_v55  ;;  %v610_v33 = vsel %vm3019_vm13, 0.0, %v2142_v28  ;;  %vm2322_vm3 = vmneg %vm3017_vm9  ;;  %v2335_v28 = vld [vmem:[%s3000_s3] sm:$0xff]  ;;  %vm3023_vm9 = vcmp.ge.s32.totalorder %v1979_v11, 1  ;;  %vm675_vm13 = vcmp.ge.s32.totalorder %v1979_v11, 2 }
 0x2a9   : > { %v720_v59 = vpop.permute.xlu0 %719  ;;  %v824_v37 = vsel %vm823_vm5, %v820_v29, %v822_v58 }
 0x2aa   : > { %968 = vmatpush.msra.mxu2 %v2051_v14  ;;  %1694 = vmatpush.msk.msra.mxu3 %vm728_vm10, %v824_v37 }
 0x2ac   : > { %1683 = vmatpush.msk.msra.mxu2 %vm355_vm6, %v620_v60  ;;  %1695 = vmatpush.msk.msra.mxu3 %vm3018_vm2, %v813_v61 }
 0x2ae   : > { %1684 = vmatpush.msk.msra.mxu2 %vm3018_vm2, %v610_v33  ;;  %990 = vmatpush.msra.mxu3 %v2073_v19  ;;  %vm3024_vm2 = vcmask 793600  }
 0x2af   : > { %v899_v8 = vsel %vm3024_vm2, %v2191_v42, 0.0  ;;  %vm3026_vm2 = vcmask 900096  }
 0x2b0   : > { %v668_v26 = vpop.permute.xlu2 %667  ;;  %v752_v63 = vpop.permute.xlu1 %751  ;;  %1686 = vmatpush.msk.msra.mxu2 %vm2322_vm3, %v2182_v40  ;;  %v877_v16 = vsel %vm3026_vm2, %v872_v18, 0.0  ;;  %vm3031_vm2 = vcmask 252928  }
 0x2b1   : > { %v709_v1 = vpop.permute.xlu0 %708  ;;  %v753_v7 = vsel %vm3020_vm14, %v2206_v48, %v752_v63  ;;  %v670_v19 = vsel %vm669_vm1, %v2252_v0, %v668_v26  ;;  %vm3025_vm14 = vmmov %vm3023_vm9  ;;  %v888_v48 = vsel %vm884_vm8, %v2204_v47, 0.0  ;;  %vm729_vm1 = vcmp.lt.s32.totalorder %v1979_v11, 14  ;;  %v935_v26 = vld [vmem:[%s3000_s3 + $0x10] sm:$0xff] }
 0x2b2   : > { %1687 = vmatpush.msk.msra.mxu2 %vm355_vm6, %v591_v2  ;;  %1706 = vmatpush.msk.msrb.mxu1 %vm3023_vm9, %v753_v7  ;;  %vm3027_vm9 = vcmask 146432   ;;  %vm3030_vm8 = vcmp.lt.s32.totalorder %v1979_v11, 15 }
 0x2b3   : > { %973 = vmatmul.f32.vlgmr.msra.gmra.mxu2 %v2335_v28 }
 0x2b4   : > { %1719 = vmatpush.msk.msrb.mxu2 %vm906_vm15, %v2180_v39  ;;  %v2365_v39 = vld [vmem:[%s3000_s3 + $0x18] sm:$0xff]  ;;  %vm3029_vm15 = vcmask 244736  }
 0x2b5   : > { %v722_v21 = vsel %vm3029_vm15, %v2184_v41, %v720_v59  ;;  %vm3034_vm15 = vcmp.ge.s32.totalorder %v1979_v11, 1 }
 0x2b6   : > { %1720 = vmatpush.msk.msrb.mxu2 %vm3025_vm14, %v899_v8  ;;  %vm3028_vm14 = vcmask 908288  }
 0x2b7   : > { %v866_v17 = vsel %vm3028_vm14, %v2250_v62, 0.0  ;;  %v848_v62 = vsel %vm637_vm12, %v2272_v12, 0.0  ;;  %vm3033_vm14 = vcmask 261120   ;;  %v827_v12 = vsel %vm823_vm5, %v822_v58, 0.0 }
 0x2b8   : > { %1721 = vmatpush.msk.msrb.mxu2 %vm675_vm13, %v888_v48  ;;  %v2360_v0 = vpop.permute.xlu2 %790  ;;  %v741_v10 = vpop.permute.xlu1 %740  ;;  %v702_v41 = vsel %vm3033_vm14, %v2228_v54, %v700_v56  ;;  %vm792_vm14 = vcmask 15360   ;;  %vm781_vm5 = vcmask 113664   ;;  %v938_v48 = vld [vmem:[%s3000_s3 + $0x28] sm:$0xff] }
 0x2b9   : > { %v2367_v42 = vpop.permute.xlu0 %777  ;;  %v743_v47 = vsel %vm3027_vm9, %v2166_v34, %v741_v10  ;;  %v711_v34 = vsel %vm3031_vm2, %v2193_v44, %v709_v1  ;;  %vm3032_vm9 = vmmov %vm3030_vm8  ;;  %v838_v44 = vsel %vm834_vm11, %v2278_v20, 0.0  ;;  %v816_v20 = vsel %vm339_vm0, %v2287_v51, 0.0 }
 0x2ba   : > { %1722 = vmatpush.msk.msrb.mxu2 %vm729_vm1, %v877_v16  ;;  %1707 = vmatpush.msk.msrb.mxu1 %vm675_vm13, %v743_v47  ;;  %vm3036_vm2 = vmmov %vm3034_vm15 }
 0x2bb   : > { %976 = vmatmul.f32.gmra.mxu2 %v2365_v39  ;;  %vm3037_vm11 = vmmov %vm3032_vm9 }
 0x2bc   : > { %1723 = vmatpush.msk.msrb.mxu2 %vm3030_vm8, %v866_v17  ;;  %1708 = vmatpush.msk.msrb.mxu1 %vm729_vm1, %v722_v21  ;;  %vm3035_vm8 = vcmask 269312  }
 0x2be   : > { %1724 = vmatpush.msk.msrb.mxu2 %vm407_vm7, %v2270_v9  ;;  %1709 = vmatpush.msk.msrb.mxu1 %vm3032_vm9, %v711_v34  ;;  %vm3038_vm9 = vcmask 908288  }
 0x2c0   : > { %1725 = vmatpush.msk.msrb.mxu2 %vm3034_vm15, %v848_v62  ;;  %v770_v18 = vpop.permute.xlu2 %769  ;;  %v800_v23 = vpop.permute.xlu1 %799  ;;  %1030 = vmatpush.msrb.mxu1 %v702_v41  ;;  %vm3039_vm15 = vmmov %vm3037_vm11 }
 0x2c1   : > { %v689_v25 = vpop.permute.xlu0 %688  ;;  %v806_v9 = vsel %vm368_vm4, 0.0, %v800_v23 }
 0x2c2   : > { %1726 = vmatpush.msk.msrb.mxu2 %vm675_vm13, %v838_v44  ;;  %1696 = vmatpush.msk.msra.mxu3 %vm355_vm6, %v806_v9  ;;  %v691_v54 = vsel %vm3035_vm8, %v2235_v57, %v689_v25  ;;  %v660_v57 = vsel %vm3038_vm9, %v2140_v27, 0.0  ;;  %vm3040_vm8 = vcmp.ge.s32.totalorder %v1984_v13, 2  ;;  %v641_v27 = vsel %vm637_vm12, %v2121_v24, 0.0 }
 0x2c3   : > { %1710 = vmatpush.msk.msrb.mxu1 %vm3036_vm2, %v691_v54  ;;  %vm926_vm9 = vcmask 769024  }
 0x2c4   : > { %1727 = vmatpush.msk.msrb.mxu2 %vm729_vm1, %v827_v12 }
 0x2c5   : > { %1711 = vmatpush.msk.msrb.mxu1 %vm675_vm13, %v670_v19 }
 0x2c6   : > { %1728 = vmatpush.msk.msrb.mxu2 %vm3037_vm11, %v816_v20 }
 0x2c7   : > { %1712 = vmatpush.msk.msrb.mxu1 %vm3039_vm15, %v660_v57  ;;  %vm3041_vm15 = vmmov %vm3036_vm2 }
 0x2c8   : > { %1059 = vmatpush.msrb.mxu2 %v2092_v22  ;;  %v925_v29 = vpop.permute.xlu2 %924  ;;  %v789_v35 = vpop.permute.xlu1 %788  ;;  %v785_v22 = vsel %vm781_vm5, 0.0, %v2367_v42 }
 0x2c9   : > { %1713 = vmatpush.msk.msrb.mxu1 %vm407_vm7, %v2151_v30  ;;  %v760_v36 = vpop.permute.xlu0 %759  ;;  %v796_v43 = vsel %vm792_vm14, 0.0, %v789_v35  ;;  %v630_v30 = vsel %vm339_vm0, %v2155_v32, 0.0  ;;  %v930_v32 = vsel %vm926_vm9, %v925_v29, 0.0  ;;  %v793_v56 = vsel %vm792_vm14, %v789_v35, %v2360_v0 }
 0x2ca   : > { %1697 = vmatpush.msk.msra.mxu3 %vm3040_vm8, %v796_v43  ;;  %vm3042_vm8 = vcmask 121856  }
 0x2cb   : > { %1714 = vmatpush.msk.msrb.mxu1 %vm3036_vm2, %v641_v27  ;;  %vm3043_vm2 = vcmp.lt.s32.totalorder %v1984_v13, 15 }
 0x2cc   : > { %1698 = vmatpush.msk.msra.mxu3 %vm728_vm10, %v785_v22 }
 0x2cd   : > { %1715 = vmatpush.msk.msrb.mxu1 %vm3037_vm11, %v630_v30 }
 0x2cf   : > { %1037 = vmatpush.msrb.mxu1 %v2053_v15  ;;  %v934_v15 = vld [vmem:[%s3000_s3 + $0x8] sm:$0xff] }
 0x2d0   : > { %v923_v46 = vpop.permute.xlu2 %922  ;;  %v768_v50 = vpop.permute.xlu1 %767 }
 0x2d1   : > { %1716 = vmatpush.msk.msrb.mxu1 %vm3041_vm15, %v2197_v45  ;;  %v780_v24 = vpop.permute.xlu0 %779  ;;  %v774_v51 = vsel %vm3042_vm8, 0.0, %v768_v50  ;;  %v927_v49 = vsel %vm926_vm9, %v923_v46, %v925_v29  ;;  %vm915_vm15 = vcmask 777216   ;;  %vm3045_vm8 = vmmov %vm3037_vm11  ;;  %vm3046_vm9 = vcmask 121856  }
 0x2d2   : > { %1699 = vmatpush.msk.msra.mxu3 %vm3043_vm2, %v774_v51  ;;  %1702 = vmatpush.msk.msrb.mxu0 %vm728_vm10, %v927_v49  ;;  %vm3044_vm10 = vcmp.ge.s32.totalorder %v1979_v11, 1  ;;  %v782_v58 = vsel %vm781_vm5, %v2367_v42, %v780_v24  ;;  %v771_v59 = vsel %vm3046_vm9, %v768_v50, %v770_v18  ;;  %vm3047_vm2 = vmmov %vm3045_vm8 }
 0x2d3   : > { %1717 = vmatpush.msk.msrb.mxu1 %vm3037_vm11, %v2174_v38  ;;  %v937_v38 = vld [vmem:[%s3000_s3 + $0x20] sm:$0xff] }
 0x2d4   : > { %1701 = vmatpush.msk.msra.mxu3 %vm2322_vm3, %v760_v36 }
 0x2d5   : > { %996 = vmatmul.f32.vlgmr.msra.gmra.mxu3 %v934_v15 }
 0x2d6   : > { %1733 = vmatpush.msk.msrb.mxu3 %vm729_vm1, %v930_v32 }
 0x2d8   : > { %v802_v45 = vpop.permute.xlu1 %801 }
 0x2d9   : > { %v914_v52 = vpop.permute.xlu0 %913  ;;  %v803_v53 = vsel %vm368_vm4, %v800_v23, %v802_v45 }
 0x2da   : > { %1729 = vmatpush.msk.msrb.mxu2 %vm3044_vm10, %v803_v53  ;;  %v919_v55 = vsel %vm915_vm15, %v914_v52, 0.0  ;;  %vm3053_vm10 = vcmask 138240  }
 0x2db   : > { %1734 = vmatpush.msk.msrb.mxu3 %vm3045_vm8, %v919_v55 }
 0x2dc   : > { %1730 = vmatpush.msk.msrb.mxu2 %vm675_vm13, %v793_v56  ;;  %vm3048_vm13 = vcmp.lt.s32.totalorder %v1984_v13, 15 }
 0x2dd   : > { %999 = vmatmul.f32.gmra.mxu3 %v937_v38 }
 0x2de   : > { %1731 = vmatpush.msk.msrb.mxu2 %vm729_vm1, %v782_v58  ;;  %vm3049_vm1 = vcmask 130048  }
 0x2df   : > { %vm3050_vm14 = vmmov %vm3049_vm1 }
 0x2e0   : > { %v1847_v37 = vpop.permute.xlu1 %1846  ;;  %1732 = vmatpush.msk.msrb.mxu2 %vm3047_vm2, %v771_v59  ;;  %vm3051_vm5 = vmmov %vm3049_vm1  ;;  %vm3057_vm2 = vcmask 121856  }
 0x2e1   : > { %v1849_v60 = vunpack.i.h.bf16 %v1847_v37  ;;  %v1848_v61 = vunpack.i.l.bf16 %v1847_v37  ;;  %v912_v33 = vpop.permute.xlu0 %911  ;;  %vm3052_vm11 = vmmov %vm3049_vm1 }
 0x2e2   : > { %v916_v63 = vsel %vm915_vm15, %v912_v33, %v914_v52  ;;  %vm3054_vm15 = vcmp.ge.s32.totalorder %v1979_v11, 1  ;;  %vm3055_vm8 = vmmov %vm3049_vm1 }
 0x2e3   : > { %1703 = vmatpush.msk.msrb.mxu0 %vm3048_vm13, %v916_v63  ;;  %v598_v1 = vsel %vm3049_vm1, %v2182_v40, %v1849_v60  ;;  %v763_v2 = vsel %vm3050_vm14, %v760_v36, %v1848_v61  ;;  %vm3056_vm9 = vmmov %vm3049_vm1  ;;  %vm3059_vm1 = vcmask 908288  }
 0x2e4   : > { %1704 = vmatmul.msk.f32.vlgmr.msrb.gmra.mxu0 %vm3051_vm5, %v935_v26  ;;  %1040 = vmatpush.msrb.mxu1 %v598_v1  ;;  %vm3058_vm13 = vmmov %vm3057_vm2 }
 0x2e5   : > { %1064 = vmatpush.msrb.mxu2 %v763_v2  ;;  %1735 = vmatmul.msk.f32.vlgmr.msrb.gmra.mxu3 %vm3052_vm11, %v935_v26  ;;  %vm3060_vm14 = vmmov %vm3059_vm1  ;;  %vm3062_vm11 = vcmp.lt.s32.totalorder %v1984_v13, 15 }
 0x2e6   : > { %1065 = vmatmul.f32.vlgmr.msrb.gmra.mxu2 %v934_v15  ;;  %vm3061_vm5 = vmmov %vm3057_vm2 }
 0x2e8   : > { %v586_v7 = vpop.permute.xlu1 %585 }
 0x2e9   : > { %v490_v19 = vpop.permute.xlu0 %489  ;;  %v588_v8 = vsel %vm3053_vm10, %v2153_v31, %v586_v7  ;;  %vm3063_vm10 = vmmov %vm3057_vm2 }
 0x2ea   : > { %v536_v40 = vadd.f32 %v2047_v5, %v490_v19  ;;  %v565_v0 = vadd.f32 %v2049_v6, %v490_v19  ;;  %1718 = vmatpush.msk.msrb.mxu1 %vm3054_vm15, %v588_v8  ;;  %vm3064_vm15 = vmmov %vm3062_vm11 }
 0x2eb   : > { %1042 = vmatmul.f32.vlgmr.msrb.gmra.mxu1 %v2335_v28 }
 0x2ec   : > { %v2499_v10 = vmax.f32 %v536_v40, 0.0  ;;  %v2501_v42 = vmax.f32 %v565_v0, 0.0  ;;  %1705 = vmatmul.msk.f32.gmra.mxu0 %vm3055_vm8, %v938_v48  ;;  %vm3065_vm8 = vmmov %vm3057_vm2 }
 0x2ed   : > { %1736 = vmatmul.msk.f32.gmra.mxu3 %vm3056_vm9, %v938_v48  ;;  %vm3066_vm9 = vmmov %vm3062_vm11 }
 0x2ee   : > { %1348 = vrot.lane.b32.xlu0 %v2501_v42, %s1883_s13  ;;  %1228 = vrot.lane.b32.xlu2 %v2501_v42, %s1882_s12 }
 0x2ef   : > { %1226 = vrot.lane.b32.xlu1 %v2499_v10, %s1882_s12  ;;  %1068 = vmatmul.f32.gmra.mxu2 %v937_v38 }
 0x2f0   : > { %v2511_v5 = vpop.permute.xlu1 %948 }
 0x2f3   : > { %1045 = vmatmul.f32.gmra.mxu1 %v2365_v39  ;;  %v944_v39 = vpop.permute.xlu2 %943 }
 0x2f6   : > { %1188 = vrot.lane.b32.xlu0 %v2501_v42, %s1888_s9 }
 0x2f8   : > { %v485_v6 = vpop.permute.xlu1 %484 }
 0x2f9   : > { %v533_v31 = vadd.f32 %v2043_v3, %v485_v6  ;;  %v562_v28 = vadd.f32 %v2045_v4, %v485_v6 }
 0x2fb   : > { %v2518_v16 = vmax.f32 %v533_v31, 0.0  ;;  %v2520_v47 = vmax.f32 %v562_v28, 0.0 }
 0x2fd   : > { %1224 = vrot.lane.b32.xlu2 %v2520_v47, %s1882_s12  ;;  %1222 = vrot.lane.b32.xlu1 %v2518_v16, %s1882_s12  ;;  %v1851_v3 = vpack.i.bf16 %v2518_v16, %v2499_v10  ;;  %v1856_v4 = vpack.i.bf16 %v2520_v47, %v2501_v42 }
 0x2fe   : > { %1182 = vrot.lane.b32.xlu0 %v2518_v16, %s1888_s9 }
 0x305   : > { %1186 = vrot.lane.b32.xlu2 %v2499_v10, %s1888_s9  ;;  %1344 = vrot.lane.b32.xlu1 %v2520_v47, %s1883_s13 }
 0x306   : > { %1154 = vrot.lane.b32.xlu0 %v2499_v10, %s1884_s14 }
 0x30d   : > { %1852 = vrot.lane.b32.xlu2 %v1851_v3, %s1883_s13  ;;  %1184 = vrot.lane.b32.xlu1 %v2520_v47, %s1888_s9 }
 0x30e   : > { %1306 = vrot.lane.b32.xlu0 %v2499_v10, %s1886_s29 }
 0x315   : > { %1308 = vrot.lane.b32.xlu2 %v2501_v42, %s1886_s29  ;;  %1857 = vrot.lane.b32.xlu1 %v1856_v4, %s1884_s14 }
 0x316   : > { %1150 = vrot.lane.b32.xlu0 %v2518_v16, %s1884_s14 }
 0x31d   : > { %1304 = vrot.lane.b32.xlu2 %v2520_v47, %s1886_s29  ;;  %1268 = vrot.lane.b32.xlu1 %v2501_v42, %s1881_s11 }
 0x31e   : > { %1378 = vrot.lane.b32.xlu0 %v2499_v10, %s1887_s30 }
 0x325   : > { %1302 = vrot.lane.b32.xlu2 %v2518_v16, %s1886_s29  ;;  %1380 = vrot.lane.b32.xlu1 %v2501_v42, %s1887_s30 }
 0x326   : > { %1374 = vrot.lane.b32.xlu0 %v2518_v16, %s1887_s30 }
 0x32d   : > { %1264 = vrot.lane.b32.xlu1 %v2520_v47, %s1881_s11 }
 0x335   : > { %1376 = vrot.lane.b32.xlu1 %v2520_v47, %s1887_s30 }
 0x336   : > { %v974_v34 = vpop.f32.mrf.mxu2 }
 0x337   : > { %v975_v41 = vadd.f32 %v974_v34, %v944_v39 }
 0x33e   : > { %v977_v20 = vpop.f32.mrf.mxu2 }
 0x33f   : > { %v978_v35 = vadd.f32 %v977_v20, %v2511_v5 }
 0x348   : > { %v1229_v17 = vpop.permute.xlu2 %1228 }
 0x357   : > { %v1225_v21 = vpop.permute.xlu2 %1224 }
 0x358   : > { %v997_v62 = vpop.f32.mrf.mxu3 }
 0x359   : > { %v998_v23 = vadd.f32 %v997_v62, %v975_v41 }
 0x35f   : > { %v2564_v18 = vpop.permute.xlu2 %1186 }
 0x360   : > { %v2566_v25 = vpop.permute.xlu0 %1348  ;;  %v1000_v29 = vpop.f32.mrf.mxu3 }
 0x361   : > { %v2568_v44 = vpop.permute.xlu1 %1226  ;;  %v1020_v9 = vpop.f32.mrf.mxu0  ;;  %v1001_v43 = vadd.f32 %v1000_v29, %v978_v35 }
 0x362   : > { %v2572_v54 = vsel %vm368_vm4, %v2568_v44, %v1229_v17  ;;  %v1021_v12 = vadd.f32 %v1020_v9, %v998_v23 }
 0x364   : > { %v2574_v57 = vmax.f32 %v1021_v12, 0.0  ;;  %v1414_v12 = vld [vmem:[%s3003_s6] sm:$0xff] }
 0x366   : > { %1310 = vrot.lane.b32.xlu0 %v2574_v57, %s1886_s29  ;;  %1190 = vrot.lane.b32.xlu2 %v2574_v57, %s1888_s9 }
 0x367   : > { %1230 = vrot.lane.b32.xlu1 %v2574_v57, %s1882_s12  ;;  %v2583_v36 = vpop.permute.xlu2 %1852 }
 0x368   : > { %v1189_v27 = vpop.permute.xlu0 %1188  ;;  %v1043_v45 = vpop.f32.mrf.mxu1 }
 0x369   : > { %v2587_v22 = vsel %vm3057_vm2, %v2564_v18, %v1189_v27  ;;  %v1023_v30 = vpop.f32.mrf.mxu0  ;;  %v1044_v38 = vadd.f32 %v1043_v45, %v944_v39  ;;  %v1066_v56 = vpop.f32.mrf.mxu2 }
 0x36a   : > { %v1024_v46 = vadd.f32 %v1023_v30, %v1001_v43  ;;  %v1089_v59 = vpop.f32.mrf.mxu3 }
 0x36b   : > { %v1067_v58 = vadd.f32 %v1066_v56, %v1044_v38 }
 0x36c   : > { %v2589_v50 = vmax.f32 %v1024_v46, 0.0  ;;  %v1251_v46 = vsel %vm368_vm4, 0.0, %v2568_v44 }
 0x36d   : > { %v1090_v1 = vadd.f32 %v1089_v59, %v1067_v58 }
 0x36e   : > { %1118 = vrot.lane.b32.xlu2 %v2574_v57, %s1890_s15  ;;  %v1861_v24 = vpack.i.bf16 %v2574_v57, %v2589_v50 }
 0x36f   : > { %1158 = vrot.lane.b32.xlu1 %v2574_v57, %s1884_s14  ;;  %v2597_v51 = vpop.permute.xlu2 %1308  ;;  %v2599_v49 = vpop.permute.xlu1 %1222  ;;  %v2638_v2 = vmax.f32 %v1090_v1, 0.0 }
 0x370   : > { %v2601_v15 = vpop.permute.xlu0 %1182  ;;  %1862 = vrot.lane.b32.xlu0 %v1861_v24, %s1883_s13  ;;  %v2606_v32 = vsel %vm368_vm4, %v2599_v49, %v1225_v21  ;;  %v1046_v7 = vpop.f32.mrf.mxu1  ;;  %v1250_v24 = vsel %vm368_vm4, 0.0, %v2599_v49 }
 0x371   : > { %v1047_v8 = vadd.f32 %v1046_v7, %v2511_v5  ;;  %v1211_v7 = vsel %vm3065_vm8, 0.0, %v2564_v18 }
 0x372   : > { %v1069_v48 = vpop.f32.mrf.mxu2  ;;  %v1092_v6 = vpop.f32.mrf.mxu3 }
 0x373   : > { %v1070_v0 = vadd.f32 %v1069_v48, %v1047_v8  ;;  %v1210_v8 = vsel %vm3057_vm2, 0.0, %v2601_v15 }
 0x375   : > { %v1093_v28 = vadd.f32 %v1092_v6, %v1070_v0 }
 0x376   : > { %1234 = vrot.lane.b32.xlu2 %v2589_v50, %s1882_s12 }
 0x377   : > { %1382 = vrot.lane.b32.xlu1 %v2574_v57, %s1887_s30  ;;  %v2612_v52 = vpop.permute.xlu2 %1304  ;;  %v2614_v53 = vpop.permute.xlu1 %1344  ;;  %v2659_v3 = vmax.f32 %v1093_v28, 0.0 }
 0x378   : > { %1162 = vrot.lane.b32.xlu0 %v2589_v50, %s1884_s14  ;;  %v2618_v55 = vpop.permute.xlu0 %1154 }
 0x379   : > { %v1866_v21 = vpack.i.bf16 %v2638_v2, %v2659_v3 }
 0x37e   : > { %1122 = vrot.lane.b32.xlu2 %v2589_v50, %s1890_s15 }
 0x37f   : > { %1194 = vrot.lane.b32.xlu1 %v2589_v50, %s1888_s9  ;;  %v1303_v37 = vpop.permute.xlu2 %1302  ;;  %v1185_v60 = vpop.permute.xlu1 %1184 }
 0x380   : > { %1314 = vrot.lane.b32.xlu0 %v2589_v50, %s1886_s29  ;;  %v1307_v61 = vpop.permute.xlu0 %1306  ;;  %v2628_v33 = vsel %vm637_vm12, %v1303_v37, %v2612_v52  ;;  %v2632_v26 = vsel %vm3058_vm13, %v2601_v15, %v1185_v60  ;;  %vm3067_vm13 = vmmov %vm3066_vm9 }
 0x381   : > { %v2636_v63 = vsel %vm637_vm12, %v1307_v61, %v2597_v51 }
 0x386   : > { %1274 = vrot.lane.b32.xlu2 %v2589_v50, %s1881_s11 }
 0x387   : > { %1386 = vrot.lane.b32.xlu1 %v2589_v50, %s1887_s30  ;;  %v2644_v19 = vpop.permute.xlu1 %1857 }
 0x388   : > { %1352 = vrot.lane.b32.xlu0 %v2638_v2, %s1883_s13  ;;  %v2649_v40 = vpop.permute.xlu0 %1150 }
 0x38e   : > { %1232 = vrot.lane.b32.xlu2 %v2638_v2, %s1882_s12 }
 0x38f   : > { %1312 = vrot.lane.b32.xlu1 %v2638_v2, %s1886_s29  ;;  %v2655_v31 = vpop.permute.xlu1 %1268 }
 0x390   : > { %1192 = vrot.lane.b32.xlu0 %v2638_v2, %s1888_s9  ;;  %v1379_v5 = vpop.permute.xlu0 %1378 }
 0x396   : > { %1272 = vrot.lane.b32.xlu2 %v2638_v2, %s1881_s11 }
 0x397   : > { %1270 = vrot.lane.b32.xlu1 %v2574_v57, %s1881_s11  ;;  %v2665_v4 = vpop.permute.xlu1 %1380 }
 0x398   : > { %1236 = vrot.lane.b32.xlu0 %v2659_v3, %s1882_s12  ;;  %v2671_v39 = vsel %vm3059_vm1, %v1379_v5, %v2665_v4  ;;  %v1375_v34 = vpop.permute.xlu0 %1374  ;;  %vm3068_vm1 = vcmask 138240  }
 0x39e   : > { %1384 = vrot.lane.b32.xlu2 %v2638_v2, %s1887_s30 }
 0x39f   : > { %1316 = vrot.lane.b32.xlu1 %v2659_v3, %s1886_s29  ;;  %v2677_v17 = vpop.permute.xlu1 %1264 }
 0x3a0   : > { %1356 = vrot.lane.b32.xlu0 %v2659_v3, %s1883_s13 }
 0x3a6   : > { %1196 = vrot.lane.b32.xlu2 %v2659_v3, %s1888_s9 }
 0x3a7   : > { %1867 = vrot.lane.b32.xlu1 %v1866_v21, %s1884_s14  ;;  %v2686_v62 = vpop.permute.xlu1 %1376 }
 0x3a8   : > { %1120 = vrot.lane.b32.xlu0 %v2638_v2, %s1890_s15  ;;  %v2692_v41 = vsel %vm3060_vm14, %v1375_v34, %v2686_v62  ;;  %vm3069_vm14 = vmmov %vm3068_vm1 }
 0x3ae   : > { %1276 = vrot.lane.b32.xlu2 %v2659_v3, %s1881_s11 }
 0x3af   : > { %1266 = vrot.lane.b32.xlu1 %v2499_v10, %s1881_s11 }
 0x3b0   : > { %1116 = vrot.lane.b32.xlu0 %v2501_v42, %s1890_s15 }
 0x3b6   : > { %1388 = vrot.lane.b32.xlu2 %v2659_v3, %s1887_s30 }
 0x3b7   : > { %1262 = vrot.lane.b32.xlu1 %v2518_v16, %s1881_s11 }
 0x3b8   : > { %1124 = vrot.lane.b32.xlu0 %v2659_v3, %s1890_s15 }
 0x3be   : > { %1114 = vrot.lane.b32.xlu2 %v2499_v10, %s1890_s15 }
 0x3c0   : > { %1112 = vrot.lane.b32.xlu0 %v2520_v47, %s1890_s15  ;;  %v2710_v23 = vpop.permute.xlu2 %1190 }
 0x3c1   : > { %v1212_v49 = vsel %vm3063_vm10, 0.0, %v2710_v23  ;;  %vm3073_vm10 = vcmask 908288  }
 0x3c6   : > { %1110 = vrot.lane.b32.xlu2 %v2518_v16, %s1890_s15 }
 0x3c8   : > { %v2714_v9 = vpop.permute.xlu2 %1118 }
 0x3c9   : > { %v1140_v21 = vsel %vm3069_vm14, 0.0, %v2714_v9  ;;  %vm3078_vm14 = vmmov %vm3057_vm2 }
 0x3ce   : > { %1417 = vperm.xlu2 %1838, %v1414_v12  }
 0x3d0   : > { %v1235_v20 = vpop.permute.xlu2 %1234 }
 0x3d1   : > { %v1253_v29 = vsel %vm368_vm4, 0.0, %v1235_v20 }
 0x3d2   : > { %1737 = vmatpush.msk.msra.mxu0 %vm355_vm6, %v1253_v29 }
 0x3d8   : > { %v2722_v35 = vpop.permute.xlu2 %1122  ;;  %v2724_v27 = vpop.permute.xlu0 %1310 }
 0x3d9   : > { %v1231_v43 = vpop.permute.xlu1 %1230  ;;  %v1141_v28 = vsel %vm3068_vm1, 0.0, %v2722_v35  ;;  %vm3077_vm1 = vcmp.lt.s32.totalorder %v1979_v11, 15 }
 0x3da   : > { %v1252_v30 = vsel %vm368_vm4, 0.0, %v1231_v43 }
 0x3db   : > { %1738 = vmatpush.msk.msra.mxu0 %vm355_vm6, %v1252_v30 }
 0x3dd   : > { %1739 = vmatpush.msk.msra.mxu0 %vm355_vm6, %v1251_v46 }
 0x3df   : > { %1740 = vmatpush.msk.msra.mxu0 %vm355_vm6, %v1250_v24 }
 0x3e0   : > { %v2737_v45 = vpop.permute.xlu2 %1274 }
 0x3e1   : > { %v2739_v38 = vpop.permute.xlu1 %1158 }
 0x3e2   : > { %v1863_v56 = vpop.permute.xlu0 %1862 }
 0x3e3   : > { %v1864_v24 = vunpack.i.l.bf16 %v1863_v56 }
 0x3e8   : > { %v1233_v58 = vpop.permute.xlu2 %1232 }
 0x3e9   : > { %v1383_v59 = vpop.permute.xlu1 %1382  ;;  %v1240_v30 = vsel %vm368_vm4, %v1231_v43, %v1233_v58  ;;  %v1854_v43 = vunpack.i.l.bf16 %v2583_v36  ;;  %v1865_v58 = vunpack.i.h.bf16 %v1863_v56  ;;  %v1855_v56 = vunpack.i.h.bf16 %v2583_v36 }
 0x3ea   : > { %v2741_v37 = vpop.permute.xlu0 %1162 }
 0x3f0   : > { %v2743_v60 = vpop.permute.xlu2 %1272 }
 0x3f1   : > { %v1195_v44 = vpop.permute.xlu1 %1194 }
 0x3f2   : > { %v1213_v61 = vsel %vm3061_vm5, 0.0, %v1195_v44  ;;  %v2746_v1 = vpop.permute.xlu0 %1314 }
 0x3f3   : > { %1741 = vmatpush.msk.msra.mxu0 %vm3062_vm11, %v1213_v61 }
 0x3f5   : > { %1742 = vmatpush.msk.msra.mxu0 %vm3064_vm15, %v1212_v49  ;;  %vm3074_vm15 = vmmov %vm3066_vm9 }
 0x3f7   : > { %1743 = vmatpush.msk.msra.mxu0 %vm3066_vm9, %v1211_v7  ;;  %vm3076_vm9 = vmmov %vm3073_vm10 }
 0x3f8   : > { %v2760_v48 = vpop.permute.xlu2 %1384 }
 0x3f9   : > { %1744 = vmatpush.msk.msra.mxu0 %vm3067_vm13, %v1210_v8  ;;  %v1387_v0 = vpop.permute.xlu1 %1386  ;;  %v1392_v7 = vsel %vm3076_vm9, %v1383_v59, %v2760_v48  ;;  %v1359_v59 = vsel %vm407_vm7, %v1854_v43, %v2566_v25  ;;  %vm3085_vm9 = vcmask 130048  }
 0x3fa   : > { %v1353_v6 = vpop.permute.xlu0 %1352 }
 0x3fb   : > { %1746 = vmatpush.msk.msra.mxu0 %vm2322_vm3, %v2741_v37 }
 0x3fd   : > { %1748 = vmatpush.msk.msra.mxu0 %vm2322_vm3, %v2739_v38 }
 0x3ff   : > { %1750 = vmatpush.msk.msra.mxu0 %vm2322_vm3, %v2618_v55 }
 0x400   : > { %v1197_v18 = vpop.permute.xlu2 %1196 }
 0x401   : > { %1752 = vmatpush.msk.msra.mxu0 %vm2322_vm3, %v2649_v40  ;;  %v2776_v15 = vpop.permute.xlu1 %1312  ;;  %vm3070_vm3 = vcmp.ge.s32.totalorder %v1979_v11, 1  ;;  %v1201_v8 = vsel %vm3057_vm2, %v1195_v44, %v1197_v18  ;;  %v2844_v18 = vld [vmem:[%s3002_s5 + $0x10] sm:$0xff]  ;;  %vm3086_vm2 = vcmask 261120  }
 0x402   : > { %v1193_v5 = vpop.permute.xlu0 %1192  ;;  %vm3071_vm5 = vmmov %vm3070_vm3 }
 0x403   : > { %1753 = vmatpush.msk.msra.mxu0 %vm355_vm6, %v1141_v28  ;;  %vm3072_vm11 = vmmov %vm3070_vm3 }
 0x404   : > { %vm3075_vm8 = vmmov %vm3070_vm3 }
 0x405   : > { %1754 = vmatpush.msk.msra.mxu0 %vm355_vm6, %v1140_v21  ;;  %v1859_v21 = vunpack.i.l.bf16 %v2644_v19 }
 0x408   : > { %v2786_v34 = vpop.permute.xlu2 %1276 }
 0x409   : > { %v2788_v12 = vpop.permute.xlu1 %1270 }
 0x40a   : > { %v1237_v14 = vpop.permute.xlu0 %1236 }
 0x40b   : > { %v1241_v29 = vsel %vm368_vm4, %v1235_v20, %v1237_v14 }
 0x40c   : > { %1770 = vmatpush.msk.msra.mxu2 %vm3070_vm3, %v1241_v29  ;;  %vm3079_vm3 = vmmov %vm3067_vm13 }
 0x40e   : > { %1771 = vmatpush.msk.msra.mxu2 %vm3071_vm5, %v1240_v30  ;;  %vm3080_vm5 = vmmov %vm3077_vm1 }
 0x410   : > { %v2796_v46 = vpop.permute.xlu2 %1388  ;;  %1772 = vmatpush.msk.msra.mxu2 %vm3072_vm11, %v2572_v54  ;;  %vm3081_vm11 = vmmov %vm3079_vm3 }
 0x411   : > { %v1393_v61 = vsel %vm3073_vm10, %v1387_v0, %v2796_v46  ;;  %v1317_v49 = vpop.permute.xlu1 %1316  ;;  %v1360_v0 = vsel %vm407_vm7, %v1865_v58, %v1353_v6  ;;  %vm3082_vm10 = vcmask 138240  }
 0x412   : > { %v1357_v20 = vpop.permute.xlu0 %1356  ;;  %1765 = vmatpush.msk.msra.mxu3 %vm3074_vm15, %v1393_v61  ;;  %1773 = vmatpush.msk.msra.mxu2 %vm3075_vm8, %v2606_v32  ;;  %v1200_v32 = vsel %vm3078_vm14, %v2710_v23, %v1193_v5  ;;  %vm3083_vm15 = vmmov %vm3077_vm1 }
 0x413   : > { %v1361_v54 = vsel %vm407_vm7, %v1864_v24, %v1357_v20  ;;  %vm3084_vm8 = vmmov %vm3077_vm1  ;;  %v1281_v24 = vsel %vm339_vm0, %v2737_v45, %v2786_v34  ;;  %v1330_v45 = vsel %vm637_vm12, %v2612_v52, 0.0  ;;  %v1293_v52 = vsel %vm339_vm0, %v2786_v34, 0.0 }
 0x414   : > { %1443 = vmatpush.msra.mxu1 %v1361_v54  ;;  %1766 = vmatpush.msk.msra.mxu3 %vm3067_vm13, %v1392_v7  ;;  %vm3087_vm13 = vmmov %vm3085_vm9 }
 0x415   : > { %1774 = vmatpush.msk.msra.mxu2 %vm3077_vm1, %v1201_v8  ;;  %vm3088_vm1 = vmmov %vm3085_vm9  ;;  %v1906_v8 = vmov 256.0  }
 0x416   : > { %1444 = vmatpush.msra.mxu1 %v1360_v0  ;;  %1767 = vmatpush.msk.msra.mxu3 %vm3079_vm3, %v2671_v39  ;;  %v1358_v39 = vsel %vm407_vm7, %v1855_v56, %v2614_v53  ;;  %vm3089_vm14 = vmmov %vm3082_vm10  ;;  %1871 = vrcp.f32 %v1906_v8 }
 0x417   : > { %1775 = vmatpush.msk.msra.mxu2 %vm3080_vm5, %v1200_v32  ;;  %vm3091_vm3 = vmmov %vm3088_vm1  ;;  %vm3092_vm5 = vcmask 908288  }
 0x418   : > { %v2828_v44 = vpop.permute.xlu2 %1114  ;;  %1445 = vmatpush.msra.mxu1 %v1359_v59  ;;  %1768 = vmatpush.msk.msra.mxu3 %vm3081_vm11, %v2692_v41  ;;  %v1405_v30 = vsel %vm3092_vm5, %v2796_v46, 0.0 }
 0x419   : > { %v1139_v23 = vsel %vm3082_vm10, 0.0, %v2828_v44  ;;  %1776 = vmatpush.msk.msra.mxu2 %vm3083_vm15, %v2587_v22  ;;  %v1868_v36 = vpop.permute.xlu1 %1867  ;;  %v1321_v22 = vsel %vm637_vm12, %v2746_v1, %v1317_v49  ;;  %1769 = vmatmul.msk.f32.vlgmr.msra.gmra.mxu3 %vm3086_vm2, %v2844_v18  ;;  %v1320_v1 = vsel %vm637_vm12, %v2724_v27, %v2776_v15  ;;  %vm3095_vm10 = vmmov %vm3092_vm5  ;;  %vm3096_vm15 = vcmp.lt.s32.totalorder %v1984_v13, 15 }
 0x41a   : > { %1782 = vmatpush.msk.msrb.mxu3 %vm407_vm7, %v1357_v20  ;;  %v1870_v28 = vunpack.i.h.bf16 %v1868_v36  ;;  %v1869_v41 = vunpack.i.l.bf16 %v1868_v36  ;;  %v2846_v5 = vpop.permute.xlu0 %1120  ;;  %1755 = vmatpush.msk.msra.mxu0 %vm355_vm6, %v1139_v23  ;;  %vm3099_vm2 = vmmov %vm3092_vm5  ;;  %v1290_v13 = vsel %vm339_vm0, %v2677_v17, 0.0 }
 0x41b   : > { %1446 = vmatpush.msra.mxu1 %v1358_v39  ;;  %1777 = vmatpush.msk.msra.mxu2 %vm3084_vm8, %v2632_v26  ;;  %v1860_v26 = vunpack.i.h.bf16 %v2644_v19  ;;  %v1099_v19 = vld [vmem:[%s3002_s5] sm:$0xff] }
 0x41c   : > { %1783 = vmatpush.msk.msrb.mxu3 %vm407_vm7, %v1353_v6  ;;  %v1169_v14 = vsel %vm3085_vm9, %v2741_v37, %v1869_v41  ;;  %v1168_v6 = vsel %vm3087_vm13, %v2739_v38, %v1870_v28  ;;  %v1333_v37 = vsel %vm637_vm12, %v1317_v49, 0.0  ;;  %vm3100_vm13 = vmmov %vm3096_vm15  ;;  %v1291_v49 = vsel %vm339_vm0, %v2655_v31, 0.0  ;;  %v1872_v0 = vpop.eup %1871 }
 0x41d   : > { %1757 = vmatpush.msk.msra.mxu1 %vm355_vm6, %v1321_v22  ;;  %1491 = vmatpush.msra.mxu2 %v1169_v14  ;;  %v1547_v32 = vmul.f32 256.0, %v1872_v0 }
 0x41e   : > { %1784 = vmatpush.msk.msrb.mxu3 %vm407_vm7, %v2566_v25  ;;  %v1167_v25 = vsel %vm3088_vm1, %v2618_v55, %v1859_v21  ;;  %v1166_v55 = vsel %vm3091_vm3, %v2649_v40, %v1860_v26  ;;  %v1404_v40 = vsel %vm3095_vm10, %v2760_v48, 0.0  ;;  %vm3109_vm10 = vcmask 261120  }
 0x41f   : > { %1758 = vmatpush.msk.msra.mxu1 %vm355_vm6, %v1320_v1  ;;  %1492 = vmatpush.msra.mxu2 %v1168_v6  ;;  %v1548_v56 = vsub.f32 1.0, %v1547_v32 }
 0x420   : > { %1785 = vmatpush.msk.msrb.mxu3 %vm407_vm7, %v2614_v53  ;;  %v1111_v29 = vpop.permute.xlu2 %1110  ;;  %vm3090_vm7 = vcmp.ge.s32.totalorder %v1979_v11, 1 }
 0x421   : > { %1759 = vmatpush.msk.msra.mxu1 %vm355_vm6, %v2636_v63  ;;  %v1138_v27 = vsel %vm3089_vm14, 0.0, %v1111_v29  ;;  %v1267_v38 = vpop.permute.xlu1 %1266  ;;  %1493 = vmatpush.msra.mxu2 %v1167_v25  ;;  %v1332_v63 = vsel %vm637_vm12, %v2776_v15, 0.0  ;;  %vm3093_vm11 = vmmov %vm3090_vm7  ;;  %v1280_v15 = vsel %vm339_vm0, %v2788_v12, %v2743_v60  ;;  %v1549_v59 = vmul.f32 %v1872_v0, %v1548_v56 }
 0x422   : > { %1786 = vmatpush.msk.msrb.mxu3 %vm3090_vm7, %v1333_v37  ;;  %v1117_v53 = vpop.permute.xlu0 %1116  ;;  %1756 = vmatpush.msk.msra.mxu0 %vm355_vm6, %v1138_v27  ;;  %v1279_v48 = vsel %vm339_vm0, %v1267_v38, %v2655_v31  ;;  %vm3101_vm1 = vmmov %vm3090_vm7 }
 0x423   : > { %1760 = vmatpush.msk.msra.mxu1 %vm355_vm6, %v2628_v33  ;;  %1494 = vmatpush.msra.mxu2 %v1166_v55  ;;  %vm3094_vm6 = vmmov %vm3084_vm8  ;;  %v1331_v33 = vsel %vm637_vm12, %v2597_v51, 0.0  ;;  %v1403_v51 = vsel %vm3099_vm2, %v2665_v4, 0.0 }
 0x424   : > { %1439 = vmatmul.f32.vlgmr.msra.gmra.mxu0 %v1099_v19  ;;  %1787 = vmatpush.msk.msrb.mxu3 %vm3093_vm11, %v1332_v63  ;;  %vm3097_vm8 = vmmov %vm3090_vm7  ;;  %vm3107_vm11 = vcmask 138240  }
 0x425   : > { %1794 = vmatpush.msk.msrb.mxu0 %vm3094_vm6, %v1405_v30  ;;  %1761 = vmatpush.msk.msra.mxu1 %vm3096_vm15, %v1281_v24  ;;  %vm3098_vm9 = vmmov %vm3094_vm6 }
 0x426   : > { %1788 = vmatpush.msk.msrb.mxu3 %vm3097_vm8, %v1331_v33  ;;  %vm3102_vm14 = vmmov %vm3094_vm6 }
 0x427   : > { %1795 = vmatpush.msk.msrb.mxu0 %vm3098_vm9, %v1404_v40  ;;  %1762 = vmatpush.msk.msra.mxu1 %vm3100_vm13, %v1280_v15  ;;  %vm3103_vm7 = vmmov %vm3099_vm2 }
 0x428   : > { %1789 = vmatpush.msk.msrb.mxu3 %vm3101_vm1, %v1330_v45  ;;  %v1402_v12 = vsel %vm3103_vm7, %v2686_v62, 0.0  ;;  %vm3104_vm12 = vmmov %vm3100_vm13  ;;  %v1292_v62 = vsel %vm339_vm0, %v2743_v60, 0.0 }
 0x429   : > { %1796 = vmatpush.msk.msrb.mxu0 %vm3102_vm14, %v1403_v51  ;;  %1763 = vmatpush.msk.msra.mxu1 %vm3104_vm12, %v1279_v48  ;;  %v1263_v4 = vpop.permute.xlu1 %1262  ;;  %vm3105_vm3 = vmmov %vm3094_vm6 }
 0x42a   : > { %v1278_v46 = vsel %vm339_vm0, %v1263_v4, %v2677_v17  ;;  %1790 = vmatpush.msk.msrb.mxu3 %vm3105_vm3, %v1293_v52  ;;  %vm3106_vm5 = vmmov %vm3105_vm3  ;;  %v1125_v61 = vpop.permute.xlu0 %1124 }
 0x42b   : > { %1797 = vmatpush.msk.msrb.mxu0 %vm3106_vm5, %v1402_v12  ;;  %v1129_v34 = vsel %vm3107_vm11, %v2722_v35, %v1125_v61  ;;  %vm3108_vm6 = vmmov %vm3104_vm12 }
 0x42c   : > { %1764 = vmatpush.msk.msra.mxu1 %vm3108_vm6, %v1278_v46  ;;  %1798 = vmatmul.msk.f32.vlgmr.msrb.gmra.mxu0 %vm3109_vm10, %v2844_v18  ;;  %vm3110_vm15 = vmmov %vm3105_vm3 }
 0x42d   : > { %1791 = vmatpush.msk.msrb.mxu3 %vm3110_vm15, %v1292_v62  ;;  %vm3111_vm8 = vmmov %vm3101_vm1 }
 0x42e   : > { %1778 = vmatpush.msk.msra.mxu2 %vm3111_vm8, %v1129_v34  ;;  %vm3112_vm9 = vmmov %vm3107_vm11  ;;  %1455 = vmatpush.msra.mxu1 %v2589_v50  ;;  %v1100_v50 = vld [vmem:[%s3002_s5 + $0x8] sm:$0xff] }
 0x42f   : > { %v1128_v60 = vsel %vm3112_vm9, %v2714_v9, %v2846_v5  ;;  %vm3113_vm2 = vmmov %vm3105_vm3  ;;  %vm1551_vm3 = vweird.f32 %v1872_v0 }
 0x430   : > { %1792 = vmatpush.msk.msrb.mxu3 %vm3113_vm2, %v1291_v49  ;;  %vm3114_vm13 = vmmov %vm3101_vm1  ;;  %1456 = vmatpush.msra.mxu1 %v2574_v57  ;;  %v1418_v57 = vpop.permute.xlu2 %1417 }
 0x431   : > { %1779 = vmatpush.msk.msra.mxu2 %vm3114_vm13, %v1128_v60  ;;  %vm3115_vm1 = vmmov %vm3112_vm9 }
 0x432   : > { %v1127_v35 = vsel %vm3115_vm1, %v2828_v44, %v1117_v53  ;;  %vm3116_vm14 = vmmov %vm3113_vm2  ;;  %1457 = vmatpush.msra.mxu1 %v2499_v10  ;;  %v1113_v31 = vpop.permute.xlu0 %1112  ;;  %v1550_v44 = vadd.f32 %v1872_v0, %v1549_v59 }
 0x433   : > { %1793 = vmatpush.msk.msrb.mxu3 %vm3116_vm14, %v1290_v13  ;;  %vm3117_vm7 = vmmov %vm3111_vm8 }
 0x434   : > { %1780 = vmatpush.msk.msra.mxu2 %vm3117_vm7, %v1127_v35  ;;  %vm3118_vm0 = vmmov %vm3115_vm1  ;;  %1458 = vmatpush.msra.mxu1 %v2518_v16  ;;  %v1552_v23 = vsel %vm1551_vm3, %v1872_v0, %v1550_v44 }
 0x435   : > { %1515 = vmatpush.msrb.mxu3 %v2659_v3  ;;  %v1126_v17 = vsel %vm3118_vm0, %v1111_v29, %v1113_v31  ;;  %1459 = vmatmul.f32.vlgmr.msra.gmra.mxu1 %v1100_v50  ;;  %vm3119_vm12 = vmmov %vm3117_vm7 }
 0x436   : > { %1781 = vmatpush.msk.msra.mxu2 %vm3119_vm12, %v1126_v17 }
 0x437   : > { %1516 = vmatpush.msrb.mxu3 %v2638_v2  ;;  %1499 = vmatmul.f32.vlgmr.msra.gmra.mxu2 %v1099_v19 }
 0x439   : > { %1517 = vmatpush.msrb.mxu3 %v2501_v42 }
 0x43b   : > { %1518 = vmatpush.msrb.mxu3 %v2520_v47 }
 0x43c   : > { %1519 = vmatmul.f32.vlgmr.msrb.gmra.mxu3 %v1100_v50 }
 0x49c   : > { %v1480_v20 = vpop.f32.mrf.mxu3 }
 0x4a1   : > { %v1440_v10 = vpop.f32.mrf.mxu0 }
 0x4a2   : > { %v1441_v3 = vadd.f32 %v1440_v10, %v1418_v57 }
 0x4a9   : > { %v1540_v42 = vpop.f32.mrf.mxu0 }
 0x4b2   : > { %v1460_v9 = vpop.f32.mrf.mxu1 }
 0x4b3   : > { %v1461_v43 = vadd.f32 %v1460_v9, %v1441_v3 }
 0x4b5   : > { %v1481_v16 = vadd.f32 %v1480_v20, %v1461_v43 }
 0x4b7   : > { %1563 = vst [vmem:[%s313_s17] sm:$0xff] %v1481_v16 }
 0x4ba   : > { %v1500_v11 = vpop.f32.mrf.mxu2 }
 0x4bb   : > { %v1501_v2 = vadd.f32 %v1500_v11, %v1418_v57 }
 0x4bf   : > { %v1520_v58 = vpop.f32.mrf.mxu3 }
 0x4c0   : > { %v1521_v7 = vadd.f32 %v1520_v58, %v1501_v2 }
 0x4c2   : > { %v1541_v47 = vadd.f32 %v1540_v42, %v1521_v7 }
 0x4c4   : > { %1564 = vst [vmem:[%s313_s17 + $0x8] sm:$0xff] %v1541_v47  ;;  %v1543_v54 = vadd.f32 %v1541_v47, %v1481_v16 }
 0x4c6   : > { %1544 = vadd.xlane.f32.xlu0 %v1543_v54 }
 0x539   : > { %v1545_v36 = vpop.xlane.xlu0 %1544 }
 0x53a   : > { %v1553_v39 = vmul.f32 %v1552_v23, %v1545_v36 }
 0x53c   : > { %v1554_v18 = vsub.f32 %v1481_v16, %v1553_v39  ;;  %v1555_v28 = vsub.f32 %v1541_v47, %v1553_v39  ;;  %1561 = vst.msk [vmem:[%s318_s20] sm:$0xff] %vm368_vm4, %v1553_v39 }
 0x53e   : > { %v1556_v41 = vmul.f32 %v1554_v18, %v1554_v18  ;;  %v1557_v5 = vmul.f32 %v1555_v28, %v1555_v28 }
 0x540   : > { %v1558_v22 = vadd.f32 %v1557_v5, %v1556_v41 }
 0x542   : > { %1559 = vadd.xlane.f32.xlu1 %v1558_v22 }
 0x5b5   : > { %v1560_v21 = vpop.xlane.xlu1 %1559 }
 0x5b6   : > { %1562 = vst.msk [vmem:[%s318_s20 + $0x8] sm:$0xff] %vm368_vm4, %v1560_v21 }
 0x5b7 PF: > { %s19_s27 = sadd.s32 1, %s1879_s27  }
 0x5b8   : > { %p16_p4 = scmp.ge.s32.totalorder %s19_s27, 4  }
 0x5ba   :  { %18 = sbr.rel (!%p16_p4) target bundleno = 1 (0x1), region = 91 }

</bundles_post_ra>
